<compile_context>
chip_gen: v5e
topology: v5e:2x2
jax: 0.10.0
libtpu: 0.0.40
codegen_flags: <defaults>
</compile_context>

<pallas_src>
import jax
import jax.numpy as jnp
from jax.experimental import pallas as pl
from jax.experimental.pallas import tpu as pltpu


def _scale_conv1x1_kernel(s_ref, x_ref, w_ref, o_ref, acc_ref):
    # s_ref:   (1, tk)    f32   per-channel scale slice
    # x_ref:   (tk, M)    f32   channels x pixels slice
    # w_ref:   (tco, tk)  bf16  conv weight tile
    # o_ref:   (tco, M)   f32   output tile (resident across the K axis)
    # acc_ref: (tco, M)   f32   VMEM accumulator
    k = pl.program_id(1)

    @pl.when(k == 0)
    def _init():
        acc_ref[...] = jnp.zeros_like(acc_ref)

    # Fold the per-channel scale into the weight tile (sublane broadcast),
    # keep both MXU operands bf16, accumulate in f32.
    w_scaled = w_ref[...] * s_ref[...].astype(jnp.bfloat16)        # (tco, tk) bf16
    x_bf16 = x_ref[...].astype(jnp.bfloat16)                       # (tk, M)  bf16
    acc_ref[...] += jnp.dot(w_scaled, x_bf16,
                            preferred_element_type=jnp.float32)    # MXU

    @pl.when(k == pl.num_programs(1) - 1)
    def _store():
        o_ref[...] = acc_ref[...]


def fused_scale_conv1x1(x_nchw, scale_nc11, weight_oi, *, tco=192, tk=768):
    """x_nchw: (1, Cin, H, W), scale_nc11: (1, Cin, 1, 1), weight_oi: (Cout, Cin)."""
    N, Cin, H, W = x_nchw.shape
    Cout = weight_oi.shape[0]
    assert N == 1, "module spec has N == 1 (free-reshape layout relies on it)"
    assert Cout % tco == 0 and Cin % tk == 0 and tk % 128 == 0

    M = H * W
    x_mat = x_nchw.reshape(Cin, M)              # free reshape (N == 1)
    scale = scale_nc11.reshape(1, Cin)          # free reshape
    w_bf16 = weight_oi.astype(jnp.bfloat16)     # halve dominant weight DMA

    n_co = Cout // tco
    n_k = Cin // tk

    flops = 2 * M * Cin * Cout
    bytes_accessed = (Cout * Cin * 2            # bf16 weight
                      + Cin * M * 4             # f32 x
                      + Cin * 4                 # scale
                      + Cout * M * 4)           # f32 output

    out = pl.pallas_call(
        _scale_conv1x1_kernel,
        out_shape=jax.ShapeDtypeStruct((Cout, M), jnp.float32),
        grid_spec=pltpu.PrefetchScalarGridSpec(
            num_scalar_prefetch=0,
            grid=(n_co, n_k),
            in_specs=[
                pl.BlockSpec((1, tk), lambda co, k: (0, k)),     # scale
                pl.BlockSpec((tk, M), lambda co, k: (k, 0)),     # x
                pl.BlockSpec((tco, tk), lambda co, k: (co, k)),  # weight
            ],
            out_specs=pl.BlockSpec((tco, M), lambda co, k: (co, 0)),
            scratch_shapes=[pltpu.VMEM((tco, M), jnp.float32)],
        ),
        compiler_params=pltpu.CompilerParams(
            dimension_semantics=("parallel", "arbitrary")),
        cost_estimate=pl.CostEstimate(
            flops=flops, transcendentals=0, bytes_accessed=bytes_accessed),
    )(scale, x_mat, w_bf16)

    return out.reshape(N, Cout, H, W)           # free reshape (N == 1)


if __name__ == "__main__":
    # Shapes implied by the module's forward
    N, Cin, H, W = 1, 2304, 7, 7
    Cout = 384

    key = jax.random.PRNGKey(0)
    k1, k2, k3 = jax.random.split(key, 3)
    x821 = jax.random.normal(k1, (N, Cin, H, W), dtype=jnp.float32)   # feature map
    x826 = jax.random.normal(k2, (1, Cin, 1, 1), dtype=jnp.float32)   # per-channel scale
    # Conv2d(2304, 384, 1, bias=False) weight
    weight = jax.random.normal(k3, (Cout, Cin), dtype=jnp.float32) * (1.0 / (Cin ** 0.5))

    out = fused_scale_conv1x1(x821, x826, weight)
    out = jax.block_until_ready(out)

    # Sanity check against a pure-JAX f32 reference (tolerance loosened for the
    # bf16 weight/activation path; f32 accumulation keeps error ~1e-2).
    ref = jnp.einsum('oc,nchw->nohw', weight, x821 * x826)
    assert out.shape == (N, Cout, H, W)
    assert jnp.allclose(out, ref, atol=5e-2, rtol=5e-2)

    print("KERNEL_OK")
</pallas_src>

<mosaic_0001>
module attributes {stable_mosaic.version = 11 : i64} {
  func.func @_scale_conv1x1_kernel(%arg0: i32, %arg1: i32, %arg2: memref<1x768xf32, #tpu.memory_space<vmem>>, %arg3: memref<768x49xf32, #tpu.memory_space<vmem>>, %arg4: memref<192x768xbf16, #tpu.memory_space<vmem>>, %arg5: memref<192x49xf32, #tpu.memory_space<vmem>>, %arg6: memref<192x49xf32, #tpu.memory_space<vmem>>) attributes {dimension_semantics = [#tpu.dimension_semantics<parallel>, #tpu.dimension_semantics<arbitrary>], iteration_bounds = array<i64: 2, 3>, scalar_prefetch = 0 : i64, scratch_operands = 1 : i64, tpu.core_type = #tpu.core_type<tc>, window_params = [{transform_indices = @transform_0, window_bounds = array<i64: 1, 768>}, {transform_indices = @transform_1, window_bounds = array<i64: 768, 49>}, {transform_indices = @transform_2, window_bounds = array<i64: 192, 768>}, {transform_indices = @transform_3, window_bounds = array<i64: 192, 49>}]} {
    %c0_i32 = arith.constant 0 : i32
    %0 = arith.cmpi eq, %arg1, %c0_i32 : i32
    %1 = arith.extui %0 : i1 to i32
    %c0_i32_0 = arith.constant 0 : i32
    %2 = arith.cmpi ne, %1, %c0_i32_0 : i32
    scf.if %2 {
      %cst_11 = arith.constant 0.000000e+00 : f32
      %17 = vector.broadcast %cst_11 : f32 to vector<192x49xf32>
      %c0_12 = arith.constant 0 : index
      %c0_13 = arith.constant 0 : index
      %18 = vector.load %arg6[%c0_12, %c0_13] : memref<192x49xf32, #tpu.memory_space<vmem>>, vector<192x49xf32>
      tpu.vector_store %arg6[%c0_12, %c0_13], %17 {strides = array<i32>} : memref<192x49xf32, #tpu.memory_space<vmem>>, vector<192x49xf32>,
    } else {
    }
    %c0 = arith.constant 0 : index
    %c0_1 = arith.constant 0 : index
    %3 = vector.load %arg4[%c0, %c0_1] : memref<192x768xbf16, #tpu.memory_space<vmem>>, vector<192x768xbf16>
    %c0_2 = arith.constant 0 : index
    %c0_3 = arith.constant 0 : index
    %4 = vector.load %arg2[%c0_2, %c0_3] : memref<1x768xf32, #tpu.memory_space<vmem>>, vector<1x768xf32>
    %5 = arith.truncf %4 : vector<1x768xf32> to vector<1x768xbf16>
    %6 = vector.broadcast %5 : vector<1x768xbf16> to vector<192x768xbf16>
    %7 = arith.mulf %3, %6 : vector<192x768xbf16>
    %c0_4 = arith.constant 0 : index
    %c0_5 = arith.constant 0 : index
    %8 = vector.load %arg3[%c0_4, %c0_5] : memref<768x49xf32, #tpu.memory_space<vmem>>, vector<768x49xf32>
    %9 = arith.truncf %8 : vector<768x49xf32> to vector<768x49xbf16>
    %c0_6 = arith.constant 0 : index
    %c0_7 = arith.constant 0 : index
    %10 = vector.load %arg6[%c0_6, %c0_7] : memref<192x49xf32, #tpu.memory_space<vmem>>, vector<192x49xf32>
    %cst = arith.constant dense<0.000000e+00> : vector<192x49xf32>
    %11 = tpu.matmul %7, %9, %cst {dimension_numbers = #tpu.dot_dimension_numbers<[1], [0], [0], [1], [0, 0, 1, 1], [], []>} : vector<192x768xbf16>, vector<768x49xbf16>, vector<192x49xf32> -> vector<192x49xf32>
    %12 = arith.addf %10, %11 : vector<192x49xf32>
    %c0_8 = arith.constant 0 : index
    %c0_9 = arith.constant 0 : index
    %13 = vector.load %arg6[%c0_8, %c0_9] : memref<192x49xf32, #tpu.memory_space<vmem>>, vector<192x49xf32>
    tpu.vector_store %arg6[%c0_8, %c0_9], %12 {strides = array<i32>} : memref<192x49xf32, #tpu.memory_space<vmem>>, vector<192x49xf32>,
    %c2_i32 = arith.constant 2 : i32
    %14 = arith.cmpi eq, %arg1, %c2_i32 : i32
    %15 = arith.extui %14 : i1 to i32
    %c0_i32_10 = arith.constant 0 : i32
    %16 = arith.cmpi ne, %15, %c0_i32_10 : i32
    scf.if %16 {
      %c0_11 = arith.constant 0 : index
      %c0_12 = arith.constant 0 : index
      %17 = vector.load %arg6[%c0_11, %c0_12] : memref<192x49xf32, #tpu.memory_space<vmem>>, vector<192x49xf32>
      %c0_13 = arith.constant 0 : index
      %c0_14 = arith.constant 0 : index
      %18 = vector.load %arg5[%c0_13, %c0_14] : memref<192x49xf32, #tpu.memory_space<vmem>>, vector<192x49xf32>
      tpu.vector_store %arg5[%c0_13, %c0_14], %17 {strides = array<i32>} : memref<192x49xf32, #tpu.memory_space<vmem>>, vector<192x49xf32>,
    } else {
    }
    return
  }
  func.func @transform_0(%arg0: i32, %arg1: i32) -> (i32, i32) {
    %c0_i32 = arith.constant 0 : i32
    %c0_i32_0 = arith.constant 0 : i32
    return %c0_i32, %arg1 : i32, i32
  }
  func.func @transform_1(%arg0: i32, %arg1: i32) -> (i32, i32) {
    %c0_i32 = arith.constant 0 : i32
    %c0_i32_0 = arith.constant 0 : i32
    return %arg1, %c0_i32 : i32, i32
  }
  func.func @transform_2(%arg0: i32, %arg1: i32) -> (i32, i32) {
    %c0_i32 = arith.constant 0 : i32
    return %arg0, %arg1 : i32, i32
  }
  func.func @transform_3(%arg0: i32, %arg1: i32) -> (i32, i32) {
    %c0_i32 = arith.constant 0 : i32
    %c0_i32_0 = arith.constant 0 : i32
    return %arg0, %c0_i32 : i32, i32
  }
}

</mosaic_0001>

<bundles_post_ra>
// kernel: tpu_custom_call.1
= control target key start
LH: loop header
LB: loop body
LE: loop exit
PB: predicated region body
PF: predicated region fallthrough
CT: control target
= control target key end

     0   :  { %s2608_s0 = inlined_call_operand.hbm [shape: f32[1,2304], index: 0, kind: input, shape index: {}]   ;;  %s2609_s1 = inlined_call_operand.vmem [shape: f32[2304,49], index: 1, kind: input, shape index: {}]   ;;  %s2610_s2 = inlined_call_operand.hbm [shape: bf16[384,2304], index: 2, kind: input, shape index: {}]   ;;  %s2611_s3 = inlined_call_operand.vmem [shape: f32[384,49], index: 3, kind: output, shape index: {}]  }
   0x1   :  { %2616 = sst [smem:[#allocation13_spill]] %s2608_s0 }
   0x2   :  { %8 = vsyncpa [#allocation4], 0 }
   0x3   :  { %10 = vsyncpa [#allocation4 + $0x1], 0 }
   0x4   :  { %11 = vsyncpa [#allocation6], 0 }
   0x5   :  { %13 = vsyncpa [#allocation6 + $0x1], 0  ;;  %s1916_s12 = smov 0   ;;  %s1918_s13 = smov 0  }
   0x6   :  { %s1920_s14 = smov 0   ;;  %s1922_s15 = smov 0  }
   0x7   :  { %s1924_s16 = smov 0   ;;  %s1926_s17 = smov 0  }
   0x8   :  { %s1928_s18 = smov 0   ;;  %s1930_s19 = smov 0  }
   0x9   :  { %s1932_s20 = smov 0   ;;  %s1934_s21 = smov 0  }
   0xa   :  { %s1936_s22 = smov 0  }
   0xb LB: > { %2617 = sst [smem:[#allocation9_spill]] %s1882_s20  ;;  %s1598_s23 = sadd.s32 4294967295, %s1890_s22   ;;  %s1890_s22 = sphi %s1936_s22, %s19_s22   ;;  %s1886_s21 = sphi %s1934_s21, %s2630_s21   ;;  %s1882_s20 = sphi %s1932_s20, %s2629_s20   ;;  %s1878_s19 = sphi %s1930_s19, %s2628_s19   ;;  %s1874_s18 = sphi %s1928_s18, %s2627_s18   ;;  %s1870_s17 = sphi %s1926_s17, %s2636_s17   ;;  %s1866_s16 = sphi %s1924_s16, %s2635_s16   ;;  %s1862_s15 = sphi %s1922_s15, %s2634_s15   ;;  %s1858_s14 = sphi %s1920_s14, %s2633_s14   ;;  %s1854_s13 = sphi %s1918_s13, %s2632_s13   ;;  %s1850_s12 = sphi %s1916_s12, %s2631_s12  }
   0xc   : > { %2618 = sst [smem:[#allocation10_spill]] %s1886_s21  ;;  %s28_s24 = sadd.s32 1, %s1882_s20 }
   0xd   : > { %p29_p0 = scmp.ge.s32.totalorder %s28_s24, 3  ;;  %s31_s25 = sadd.s32 1, %s1886_s21 }
   0xe   : > { %s38_s26 = sadd.s32 1, %s1870_s17  ;;  %p45_p1 = scmp.ne.s32.totalorder %s1870_s17, %s1866_s16 }
   0xf   : > { %s2638_s24 = smov (%p29_p0, %s28_s24), 0  ;;  %s2640_s25 = smov (!%p29_p0, %s31_s25), %s1886_s21 }
  0x10   : > { %2619 = sst [smem:[#allocation11_spill]] %s2638_s24  ;;  %s35_s27 = ssub.s32 %s1882_s20, %s2638_s24 }
  0x11   : > { %p46_p2 = scmp.eq.s32.totalorder %s1890_s22, 0  ;;  %p33_p3 = scmp.ge.s32.totalorder %s2640_s25, 2 }
  0x12   : > { %p36_p4 = scmp.eq.s32.totalorder %s35_s27, 0  ;;  %p51_p6 = scmp.ne.s32.totalorder %s1866_s16, %s1862_s15 }
  0x13   : > { %p1983_p5 = por %p46_p2, %p45_p1  ;;  %s2642_s25 = smov (%p33_p3, %s2640_s25), 0 }
  0x14   : > { %2621 = sst [smem:[#allocation12_spill]] %s2642_s25  ;;  %p52_p7 = scmp.eq.s32.totalorder %s1598_s23, 0 }
  0x15   : > { %s1991_s29 = scalar_select %p36_p4, %s1870_s17, %s38_s26  }
  0x16   : > { %s87_s30 = ssub.s32 %s1886_s21, %s2642_s25  ;;  %s92_s5 = sadd.s32 1, %s1858_s14 }
  0x17   : > { %s89_s4 = sor.u32 %s87_s30, %s35_s27  ;;  %p1996_p8 = por %p52_p7, %p51_p6 }
  0x18   : > { %p90_p9 = scmp.eq.s32.totalorder %s89_s4, 0  ;;  %p99_p10 = scmp.ne.s32.totalorder %s1858_s14, %s1854_s13 }
  0x19   : > { %p105_p11 = scmp.ne.s32.totalorder %s1854_s13, %s1850_s12  ;;  %p1642_p0 = scmp.lt.s32.totalorder %s1890_s22, 6 }
  0x1a   : > { %s2005_s7 = scalar_select %p90_p9, %s1858_s14, %s92_s5  }
  0x1b   : > { %p2009_p12 = por %p99_p10, %p46_p2  ;;  %p2013_p13 = por %p105_p11, %p52_p7 }
  0x1c   : > { %s155_s10 = sand.u32 1, %s1870_s17   ;;  %s160_s11 = smul.u32 6, %s1882_s20 }
  0x1d   : > { %s1626_s12 = smul.u32 6, %s155_s10  ;;  %s2625_s0 = sld [smem:[#allocation13_spill]] }
  0x1e   : > { %p1636_p1 = pnand %p1642_p0, %p1983_p5  ;;  %s156_s5 = scalar_lea.sflag [#allocation4], %s155_s10 }
  0x1f   : > { %s159_s30 = scalar_lea.vmem [#allocation3], %s1626_s12  ;;  %p2031_p2 = pnand %p1642_p0, %p2009_p12 }
  0x20   : > { %s167_s4 = sshll.u32 %s159_s30, 4  ;;  %s1643_s24 = smul.u32 432, %s1886_s21  ;;  %s168_s4 = int_to_ptr.vmem [resolvable:$true] %s167_s4 }
  0x21   : > { %p1603_p3 = scmp.ge.s32.totalorder %s1890_s22, 1  ;;  %p206_p4 = scmp.lt.s32.totalorder %s1890_s22, 7 }
  0x22   : > { %s193_s28 = sadd.s32 %s1643_s24, %s160_s11  ;;  %s183_s15 = sand.u32 1, %s1858_s14  }
  0x23   : > { %s163_s26 = scalar_lea.hbm %s2625_s0, %s160_s11  ;;  %s1602_s23 = sshll.u32 %s193_s28, 2 }
  0x24   : > { %s165_s27 = sshll.u32 %s163_s26, 4  ;;  %p207_p5 = pnand %p1603_p3, %p206_p4  ;;  %s166_s27 = int_to_ptr.hbm [resolvable:$true] %s165_s27 }
  0x25   : > { %1638 = dma.hbm_to_vmem [thread:$0]  (!%p1636_p1), %s166_s27, 96, %s168_s4, %s156_s5  }
  0x26   : > { %s195_s30 = scalar_lea.hbm %s2610_s2, %s1602_s23  ;;  %s1627_s27 = smul.u32 576, %s183_s15 }
  0x27   : > { %s196_s10 = sshll.u32 %s195_s30, 4  ;;  %s184_s5 = scalar_lea.sflag [#allocation6], %s183_s15  ;;  %s197_s10 = int_to_ptr.hbm [resolvable:$true] %s196_s10 }
  0x28   : > { %s187_s8 = scalar_lea.vmem [#allocation5], %s1627_s27  ;;  %s1892_s0 = smov 1152  }
  0x29   : > { %s198_s4 = sshll.u32 %s187_s8, 4  ;;  %s1893_s21 = smov 384   ;;  %s199_s4 = int_to_ptr.vmem [resolvable:$true] %s198_s4 }
  0x2a   : > { %s1894_s20 = smov 24   ;;  %210 = sbr.rel (%p207_p5) target bundleno = 569 (0x239), region = 32 }
  0x2b   : > { %1641 = dma.hbm_to_vmem [thread:$0]  (!%p2031_p2), %s197_s10, 9216, %s199_s4, %s184_s5, %s1892_s0, %s1893_s21, %s1894_s20  }
  0x2c   : > { %s212_s24 = sand.u32 (!%p207_p5), 1, %s1866_s16  }
  0x2d   : > { %s2045_s11 = smul.u32 (!%p207_p5), 6, %s212_s24  ;;  %s213_s28 = scalar_lea.sflag (!%p207_p5), [#allocation4], %s212_s24 }
  0x2f   : > { %s216_s23 = scalar_lea.vmem [#allocation3], %s2045_s11 }
  0x30   : > { %1841 = dma.done.wait (%p1996_p8), %s213_s28, 96  }
  0x31   : > { %1843 = vsyncadd (%p1996_p8), %s213_s28, 4294967200  ;;  %s222_s15 = sand.u32 1, %s1854_s13  }
  0x32   : > { %s1630_s26 = smul.u32 576, %s222_s15  ;;  %s223_s25 = scalar_lea.sflag [#allocation6], %s222_s15 }
  0x34   : > { %s2053_s0 = scalar_lea.vmem [#allocation5], %s1630_s26 }
  0x35   : > { %1845 = dma.done.wait (%p2013_p13), %s223_s25, 9216  }
  0x36   : > { %1847 = vsyncadd (%p2013_p13), %s223_s25, 4294958080  ;;  %s261_s20 = smul.u32 96, %s1874_s18  ;;  %p1606_p8 = scmp.ne.s32.totalorder %s1874_s18, 0 }
  0x37   : > { %s269_s21 = smul.u32 24, %s1878_s19 }
  0x38   : > { %p262_p6 = scmp.lt.s32.totalorder %s261_s20, 287 }
  0x39   : > { %p270_p7 = scmp.lt.s32.totalorder %s269_s21, 47  ;;  %278 = sbr.rel (%p1606_p8) target bundleno = 87 (0x57), region = 44 }
  0x3a   : > { %s2644_s20 = smov (!%p262_p6, %s261_s20), 287 }
  0x3b   : > { %s2646_s21 = smov (!%p270_p7, %s269_s21), 47  ;;  %s1604_s6 = sshll.u32 %s2644_s20, 3 }
  0x3c   : > { %s2064_s10 = scalar_lea.vmem %s2609_s1, %s1604_s6  ;;  %s1605_s27 = sshll.u32 %s2646_s21, 3 }
  0x3d   : > { %s2069_s9 = scalar_lea.vmem %s2611_s3, %s1605_s27 }
  0x3e   : > { %vm279_vm0 = vcmask 400384   ;;  %v1895_v0 = vmov 0.0  }
  0x3f   : > { %280 = vst.msk [vmem:[#allocation2] sm:$0xff] %vm279_vm0, %v1895_v0 }
  0x40   : > { %281 = vst.msk [vmem:[#allocation2 + $0x8] sm:$0xff] %vm279_vm0, %v1895_v0 }
  0x41   : > { %282 = vst.msk [vmem:[#allocation2 + $0x10] sm:$0xff] %vm279_vm0, %v1895_v0 }
  0x42   : > { %283 = vst.msk [vmem:[#allocation2 + $0x18] sm:$0xff] %vm279_vm0, %v1895_v0 }
  0x43   : > { %284 = vst.msk [vmem:[#allocation2 + $0x20] sm:$0xff] %vm279_vm0, %v1895_v0 }
  0x44   : > { %285 = vst.msk [vmem:[#allocation2 + $0x28] sm:$0xff] %vm279_vm0, %v1895_v0 }
  0x45   : > { %286 = vst.msk [vmem:[#allocation2 + $0x30] sm:$0xff] %vm279_vm0, %v1895_v0 }
  0x46   : > { %287 = vst.msk [vmem:[#allocation2 + $0x38] sm:$0xff] %vm279_vm0, %v1895_v0 }
  0x47   : > { %288 = vst.msk [vmem:[#allocation2 + $0x40] sm:$0xff] %vm279_vm0, %v1895_v0 }
  0x48   : > { %289 = vst.msk [vmem:[#allocation2 + $0x48] sm:$0xff] %vm279_vm0, %v1895_v0 }
  0x49   : > { %290 = vst.msk [vmem:[#allocation2 + $0x50] sm:$0xff] %vm279_vm0, %v1895_v0 }
  0x4a   : > { %291 = vst.msk [vmem:[#allocation2 + $0x58] sm:$0xff] %vm279_vm0, %v1895_v0 }
  0x4b   : > { %292 = vst.msk [vmem:[#allocation2 + $0x60] sm:$0xff] %vm279_vm0, %v1895_v0 }
  0x4c   : > { %293 = vst.msk [vmem:[#allocation2 + $0x68] sm:$0xff] %vm279_vm0, %v1895_v0 }
  0x4d   : > { %294 = vst.msk [vmem:[#allocation2 + $0x70] sm:$0xff] %vm279_vm0, %v1895_v0 }
  0x4e   : > { %295 = vst.msk [vmem:[#allocation2 + $0x78] sm:$0xff] %vm279_vm0, %v1895_v0 }
  0x4f   : > { %296 = vst.msk [vmem:[#allocation2 + $0x80] sm:$0xff] %vm279_vm0, %v1895_v0 }
  0x50   : > { %297 = vst.msk [vmem:[#allocation2 + $0x88] sm:$0xff] %vm279_vm0, %v1895_v0 }
  0x51   : > { %298 = vst.msk [vmem:[#allocation2 + $0x90] sm:$0xff] %vm279_vm0, %v1895_v0 }
  0x52   : > { %299 = vst.msk [vmem:[#allocation2 + $0x98] sm:$0xff] %vm279_vm0, %v1895_v0 }
  0x53   : > { %300 = vst.msk [vmem:[#allocation2 + $0xa0] sm:$0xff] %vm279_vm0, %v1895_v0 }
  0x54   : > { %301 = vst.msk [vmem:[#allocation2 + $0xa8] sm:$0xff] %vm279_vm0, %v1895_v0 }
  0x55   : > { %302 = vst.msk [vmem:[#allocation2 + $0xb0] sm:$0xff] %vm279_vm0, %v1895_v0 }
  0x56   : > { %303 = vst.msk [vmem:[#allocation2 + $0xb8] sm:$0xff] %vm279_vm0, %v1895_v0 }
  0x57 PF: > { %v812_v1 = vld [vmem:[%s2064_s10 + $0x70] sm:$0xff]  ;;  %v813_v2 = vld [vmem:[%s2064_s10 + $0x78] sm:$0xff]  ;;  %v810_v6 = vld [vmem:[%s2064_s10 + $0x60] sm:$0xff]  ;;  %vm1404_vm1 = vcmask 400384   ;;  %p1607_p9 = scmp.ne.s32.totalorder %s1874_s18, 2 }
  0x58   : > { %v828_v3 = vld [vmem:[%s2064_s10 + $0xf0] sm:$0xff]  ;;  %v901_v4 = vpack.c.bf16 %v813_v2, %v812_v1  ;;  %v829_v5 = vld [vmem:[%s2064_s10 + $0xf8] sm:$0xff]  ;;  %v811_v7 = vld [vmem:[%s2064_s10 + $0x68] sm:$0xff] }
  0x59   : > { %v909_v8 = vpack.c.bf16 %v829_v5, %v828_v3  ;;  %v826_v9 = vld [vmem:[%s2064_s10 + $0xe0] sm:$0xff]  ;;  %v827_v10 = vld [vmem:[%s2064_s10 + $0xe8] sm:$0xff]  ;;  %v900_v11 = vpack.c.bf16 %v811_v7, %v810_v6  ;;  %v808_v13 = vld [vmem:[%s2064_s10 + $0x50] sm:$0xff] }
  0x5a   : > { %1610 = vmatpush.bf16.msra.mxu2 %v901_v4  ;;  %966 = vmatpush.bf16.msra.mxu0 %v901_v4  ;;  %v908_v12 = vpack.c.bf16 %v827_v10, %v826_v9  ;;  %v809_v14 = vld [vmem:[%s2064_s10 + $0x58] sm:$0xff]  ;;  %v824_v15 = vld [vmem:[%s2064_s10 + $0xd0] sm:$0xff]  ;;  %v806_v19 = vld [vmem:[%s2064_s10 + $0x40] sm:$0xff] }
  0x5b   : > { %1618 = vmatpush.bf16.msra.mxu3 %v909_v8  ;;  %1035 = vmatpush.bf16.msra.mxu1 %v909_v8  ;;  %v825_v16 = vld [vmem:[%s2064_s10 + $0xd8] sm:$0xff]  ;;  %v899_v17 = vpack.c.bf16 %v809_v14, %v808_v13  ;;  %v807_v20 = vld [vmem:[%s2064_s10 + $0x48] sm:$0xff]  ;;  %v822_v21 = vld [vmem:[%s2064_s10 + $0xc0] sm:$0xff] }
  0x5c   : > { %v907_v18 = vpack.c.bf16 %v825_v16, %v824_v15  ;;  %v823_v22 = vld [vmem:[%s2064_s10 + $0xc8] sm:$0xff]  ;;  %v898_v23 = vpack.c.bf16 %v807_v20, %v806_v19  ;;  %v804_v26 = vld [vmem:[%s2064_s10 + $0x30] sm:$0xff]  ;;  %v805_v27 = vld [vmem:[%s2064_s10 + $0x38] sm:$0xff] }
  0x5d   : > { %v2114_v24 = vld [vmem:[%s216_s23] sm:$0x3f]  ;;  %v906_v25 = vpack.c.bf16 %v823_v22, %v822_v21  ;;  %v820_v30 = vld [vmem:[%s2064_s10 + $0xb0] sm:$0xff]  ;;  %v821_v31 = vld [vmem:[%s2064_s10 + $0xb8] sm:$0xff]  ;;  %v897_v33 = vpack.c.bf16 %v805_v27, %v804_v26 }
  0x5e   : > { %1611 = vmatpush.bf16.msra.mxu2 %v900_v11  ;;  %967 = vmatpush.bf16.msra.mxu0 %v900_v11  ;;  %v378_v28 = vperm.slane %v2114_v24, 0  ;;  %v379_v29 = vperm.slane %v2114_v24, 1  ;;  %v905_v34 = vpack.c.bf16 %v821_v31, %v820_v30  ;;  %v802_v35 = vld [vmem:[%s2064_s10 + $0x20] sm:$0xff]  ;;  %v803_v36 = vld [vmem:[%s2064_s10 + $0x28] sm:$0xff]  ;;  %v800_v45 = vld [vmem:[%s2064_s10 + $0x10] sm:$0xff] }
  0x5f   : > { %1619 = vmatpush.bf16.msra.mxu3 %v908_v12  ;;  %1036 = vmatpush.bf16.msra.mxu1 %v908_v12  ;;  %v818_v39 = vld [vmem:[%s2064_s10 + $0xa0] sm:$0xff]  ;;  %v819_v40 = vld [vmem:[%s2064_s10 + $0xa8] sm:$0xff]  ;;  %v896_v44 = vpack.c.bf16 %v803_v36, %v802_v35  ;;  %v801_v48 = vld [vmem:[%s2064_s10 + $0x18] sm:$0xff] }
  0x60   : > { %v390_v32 = vpack.c.bf16 %v379_v29, %v378_v28  ;;  %v340_v41 = vld [vmem:[%s2053_s0 + $0x120] sm:$0xff]  ;;  %v343_v46 = vld [vmem:[%s2053_s0 + $0x138] sm:$0xff]  ;;  %v904_v47 = vpack.c.bf16 %v819_v40, %v818_v39  ;;  %v817_v54 = vld [vmem:[%s2064_s10 + $0x98] sm:$0xff]  ;;  %v895_v63 = vpack.c.bf16 %v801_v48, %v800_v45 }
  0x61   : > { %v304_v51 = vld [vmem:[%s2053_s0] sm:$0xff]  ;;  %v307_v52 = vld [vmem:[%s2053_s0 + $0x18] sm:$0xff]  ;;  %v504_v55 = vunpack.c.l.bf16 %v340_v41  ;;  %v505_v56 = vunpack.c.h.bf16 %v340_v41  ;;  %v510_v60 = vunpack.c.l.bf16 %v343_v46  ;;  %v511_v62 = vunpack.c.h.bf16 %v343_v46  ;;  %v845_v15 = vld [vmem:[%s2064_s10 + $0x178] sm:$0xff] }
  0x62   : > { %1612 = vmatpush.bf16.msra.mxu2 %v899_v17  ;;  %968 = vmatpush.bf16.msra.mxu0 %v899_v17  ;;  %v396_v37 = vunpack.c.l.b16 %v390_v32  ;;  %v397_v38 = vunpack.c.h.b16 %v390_v32  ;;  %v816_v53 = vld [vmem:[%s2064_s10 + $0x90] sm:$0xff]  ;;  %v798_v57 = vld [vmem:[%s2064_s10] sm:$0xff]  ;;  %v799_v58 = vld [vmem:[%s2064_s10 + $0x8] sm:$0xff]  ;;  %v432_v0 = vunpack.c.l.bf16 %v304_v51  ;;  %v438_v1 = vunpack.c.l.bf16 %v307_v52 }
  0x63   : > { %1620 = vmatpush.bf16.msra.mxu3 %v907_v18  ;;  %1037 = vmatpush.bf16.msra.mxu1 %v907_v18  ;;  %v433_v2 = vunpack.c.h.bf16 %v304_v51  ;;  %v903_v3 = vpack.c.bf16 %v817_v54, %v816_v53  ;;  %v439_v6 = vunpack.c.h.bf16 %v307_v52  ;;  %v894_v7 = vpack.c.bf16 %v799_v58, %v798_v57  ;;  %v814_v8 = vld [vmem:[%s2064_s10 + $0x80] sm:$0xff]  ;;  %v815_v9 = vld [vmem:[%s2064_s10 + $0x88] sm:$0xff]  ;;  %v844_v10 = vld [vmem:[%s2064_s10 + $0x170] sm:$0xff] }
  0x64   : > { %v402_v42 = vpack.c.b16 %v396_v37, %v396_v37  ;;  %v403_v43 = vpack.c.b16 %v397_v38, %v397_v38  ;;  %v860_v16 = vld [vmem:[%s2064_s10 + $0x1f0] sm:$0xff]  ;;  %v861_v17 = vld [vmem:[%s2064_s10 + $0x1f8] sm:$0xff]  ;;  %v902_v21 = vpack.c.bf16 %v815_v9, %v814_v8  ;;  %v917_v26 = vpack.c.bf16 %v845_v15, %v844_v10  ;;  %v842_v28 = vld [vmem:[%s2064_s10 + $0x160] sm:$0xff] }
  0x65   : > { %v925_v27 = vpack.c.bf16 %v861_v17, %v860_v16  ;;  %v892_v29 = vld [vmem:[%s2064_s10 + $0x2f0] sm:$0xff]  ;;  %v893_v30 = vld [vmem:[%s2064_s10 + $0x2f8] sm:$0xff]  ;;  %v859_v35 = vld [vmem:[%s2064_s10 + $0x1e8] sm:$0xff] }
  0x66   : > { %1613 = vmatpush.bf16.msra.mxu2 %v898_v23  ;;  %969 = vmatpush.bf16.msra.mxu0 %v898_v23  ;;  %v409_v49 = vpack.i.b16 %v402_v42, %v402_v42  ;;  %v413_v50 = vpack.i.b16 %v403_v43, %v403_v43  ;;  %v876_v23 = vld [vmem:[%s2064_s10 + $0x270] sm:$0xff]  ;;  %v941_v39 = vpack.c.bf16 %v893_v30, %v892_v29  ;;  %v874_v40 = vld [vmem:[%s2064_s10 + $0x260] sm:$0xff]  ;;  %v875_v41 = vld [vmem:[%s2064_s10 + $0x268] sm:$0xff] }
  0x67   : > { %1621 = vmatpush.bf16.msra.mxu3 %v906_v25  ;;  %1038 = vmatpush.bf16.msra.mxu1 %v906_v25  ;;  %v877_v25 = vld [vmem:[%s2064_s10 + $0x278] sm:$0xff]  ;;  %v840_v45 = vld [vmem:[%s2064_s10 + $0x150] sm:$0xff]  ;;  %v890_v46 = vld [vmem:[%s2064_s10 + $0x2e0] sm:$0xff]  ;;  %v932_v54 = vpack.c.bf16 %v875_v41, %v874_v40 }
  0x68   : > { %v411_v59 = vperm.slane %v409_v49, 0  ;;  %v415_v61 = vperm.slane %v413_v50, 0  ;;  %v933_v38 = vpack.c.bf16 %v877_v25, %v876_v23  ;;  %v841_v48 = vld [vmem:[%s2064_s10 + $0x158] sm:$0xff]  ;;  %v856_v49 = vld [vmem:[%s2064_s10 + $0x1d0] sm:$0xff]  ;;  %v870_v16 = vld [vmem:[%s2064_s10 + $0x240] sm:$0xff] }
  0x69   : > { %v857_v50 = vld [vmem:[%s2064_s10 + $0x1d8] sm:$0xff]  ;;  %v915_v58 = vpack.c.bf16 %v841_v48, %v840_v45  ;;  %v871_v17 = vld [vmem:[%s2064_s10 + $0x248] sm:$0xff]  ;;  %v868_v48 = vld [vmem:[%s2064_s10 + $0x230] sm:$0xff] }
  0x6a   : > { %1614 = vmatpush.bf16.msra.mxu2 %v897_v33  ;;  %970 = vmatpush.bf16.msra.mxu0 %v897_v33  ;;  %v2136_v4 = vunpack.c.l.bf16 %v411_v59  ;;  %v2138_v5 = vunpack.c.l.bf16 %v415_v61  ;;  %v843_v33 = vld [vmem:[%s2064_s10 + $0x168] sm:$0xff]  ;;  %v349_v51 = vld [vmem:[%s2053_s0 + $0x168] sm:$0xff]  ;;  %v310_v52 = vld [vmem:[%s2053_s0 + $0x30] sm:$0xff]  ;;  %v923_v59 = vpack.c.bf16 %v857_v50, %v856_v49 }
  0x6b   : > { %1622 = vmatpush.bf16.msra.mxu3 %v905_v34  ;;  %1039 = vmatpush.bf16.msra.mxu1 %v905_v34  ;;  %v858_v34 = vld [vmem:[%s2064_s10 + $0x1e0] sm:$0xff]  ;;  %v916_v42 = vpack.c.bf16 %v843_v33, %v842_v28  ;;  %v313_v53 = vld [vmem:[%s2053_s0 + $0x48] sm:$0xff]  ;;  %v523_v9 = vunpack.c.h.bf16 %v349_v51  ;;  %v445_v10 = vunpack.c.h.bf16 %v310_v52  ;;  %v887_v41 = vld [vmem:[%s2064_s10 + $0x2c8] sm:$0xff] }
  0x6c   : > { %v654_v11 = vmul.f32 %v2136_v4, %v504_v55  ;;  %v660_v12 = vmul.f32 %v2136_v4, %v510_v60  ;;  %v655_v13 = vmul.f32 %v2138_v5, %v505_v56  ;;  %v661_v14 = vmul.f32 %v2138_v5, %v511_v62  ;;  %v872_v56 = vld [vmem:[%s2064_s10 + $0x250] sm:$0xff]  ;;  %v873_v57 = vld [vmem:[%s2064_s10 + $0x258] sm:$0xff]  ;;  %v838_v60 = vld [vmem:[%s2064_s10 + $0x140] sm:$0xff] }
  0x6d   : > { %v582_v18 = vmul.f32 %v2136_v4, %v432_v0  ;;  %v588_v19 = vmul.f32 %v2136_v4, %v438_v1  ;;  %v583_v20 = vmul.f32 %v2138_v5, %v433_v2  ;;  %v589_v22 = vmul.f32 %v2138_v5, %v439_v6  ;;  %v888_v61 = vld [vmem:[%s2064_s10 + $0x2d0] sm:$0xff]  ;;  %v889_v62 = vld [vmem:[%s2064_s10 + $0x2d8] sm:$0xff]  ;;  %v854_v6 = vld [vmem:[%s2064_s10 + $0x1c0] sm:$0xff] }
  0x6e   : > { %1615 = vmatpush.bf16.msra.mxu2 %v896_v44  ;;  %971 = vmatpush.bf16.msra.mxu0 %v896_v44  ;;  %v762_v31 = vpack.c.bf16 %v660_v12, %v654_v11  ;;  %v763_v36 = vpack.c.bf16 %v661_v14, %v655_v13  ;;  %v924_v43 = vpack.c.bf16 %v859_v35, %v858_v34  ;;  %v346_v44 = vld [vmem:[%s2053_s0 + $0x150] sm:$0xff]  ;;  %v522_v0 = vunpack.c.l.bf16 %v349_v51  ;;  %v355_v33 = vld [vmem:[%s2053_s0 + $0x198] sm:$0xff]  ;;  %v316_v34 = vld [vmem:[%s2053_s0 + $0x60] sm:$0xff] }
  0x6f   : > { %1623 = vmatpush.bf16.msra.mxu3 %v904_v47  ;;  %1040 = vmatpush.bf16.msra.mxu1 %v904_v47  ;;  %v726_v32 = vpack.c.bf16 %v588_v19, %v582_v18  ;;  %v727_v37 = vpack.c.bf16 %v589_v22, %v583_v20  ;;  %v891_v47 = vld [vmem:[%s2064_s10 + $0x2e8] sm:$0xff]  ;;  %v444_v1 = vunpack.c.l.bf16 %v310_v52  ;;  %v450_v2 = vunpack.c.l.bf16 %v313_v53  ;;  %v869_v49 = vld [vmem:[%s2064_s10 + $0x238] sm:$0xff]  ;;  %v834_v50 = vld [vmem:[%s2064_s10 + $0x120] sm:$0xff] }
  0x70   : > { %v940_v55 = vpack.c.bf16 %v891_v47, %v890_v46  ;;  %v517_v8 = vunpack.c.h.bf16 %v346_v44  ;;  %v451_v11 = vunpack.c.h.bf16 %v313_v53  ;;  %v931_v12 = vpack.c.bf16 %v873_v57, %v872_v56  ;;  %v319_v35 = vld [vmem:[%s2053_s0 + $0x78] sm:$0xff]  ;;  %v884_v56 = vld [vmem:[%s2064_s10 + $0x2b0] sm:$0xff]  ;;  %v885_v57 = vld [vmem:[%s2064_s10 + $0x2b8] sm:$0xff] }
  0x71   : > { %v939_v13 = vpack.c.bf16 %v889_v62, %v888_v61  ;;  %v672_v19 = vmul.f32 %v2136_v4, %v522_v0  ;;  %v594_v20 = vmul.f32 %v2136_v4, %v444_v1  ;;  %v673_v23 = vmul.f32 %v2138_v5, %v523_v9  ;;  %v850_v62 = vld [vmem:[%s2064_s10 + $0x1a0] sm:$0xff] }
  0x72   : > { %1616 = vmatpush.bf16.msra.mxu2 %v895_v63  ;;  %972 = vmatpush.bf16.msra.mxu0 %v895_v63  ;;  %v516_v63 = vunpack.c.l.bf16 %v346_v44  ;;  %v667_v22 = vmul.f32 %v2138_v5, %v517_v8  ;;  %v595_v25 = vmul.f32 %v2138_v5, %v445_v10  ;;  %v534_v44 = vunpack.c.l.bf16 %v355_v33 }
  0x73   : > { %1624 = vmatpush.bf16.msra.mxu3 %v903_v3  ;;  %1041 = vmatpush.bf16.msra.mxu1 %v903_v3  ;;  %v839_v3 = vld [vmem:[%s2064_s10 + $0x148] sm:$0xff]  ;;  %v535_v51 = vunpack.c.h.bf16 %v355_v33  ;;  %v456_v52 = vunpack.c.l.bf16 %v316_v34  ;;  %v462_v53 = vunpack.c.l.bf16 %v319_v35  ;;  %v937_v61 = vpack.c.bf16 %v885_v57, %v884_v56  ;;  %v864_v56 = vld [vmem:[%s2064_s10 + $0x210] sm:$0xff]  ;;  %v865_v57 = vld [vmem:[%s2064_s10 + $0x218] sm:$0xff] }
  0x74   : > { %v914_v14 = vpack.c.bf16 %v839_v3, %v838_v60  ;;  %v666_v18 = vmul.f32 %v2136_v4, %v516_v63  ;;  %v769_v30 = vpack.c.bf16 %v673_v23, %v667_v22  ;;  %v851_v63 = vld [vmem:[%s2064_s10 + $0x1a8] sm:$0xff]  ;;  %v833_v23 = vld [vmem:[%s2064_s10 + $0x118] sm:$0xff] }
  0x75   : > { %v920_v0 = vpack.c.bf16 %v851_v63, %v850_v62  ;;  %v685_v8 = vmul.f32 %v2138_v5, %v535_v51  ;;  %v831_v62 = vld [vmem:[%s2064_s10 + $0x108] sm:$0xff]  ;;  %v880_v63 = vld [vmem:[%s2064_s10 + $0x290] sm:$0xff] }
  0x76   : > { %1617 = vmatpush.bf16.msra.mxu2 %v894_v7  ;;  %973 = vmatpush.bf16.msra.mxu0 %v894_v7  ;;  %v855_v7 = vld [vmem:[%s2064_s10 + $0x1c8] sm:$0xff]  ;;  %v768_v28 = vpack.c.bf16 %v672_v19, %v666_v18  ;;  %v325_v18 = vld [vmem:[%s2053_s0 + $0xa8] sm:$0xff]  ;;  %v866_v19 = vld [vmem:[%s2064_s10 + $0x220] sm:$0xff] }
  0x77   : > { %1625 = vmatpush.bf16.msra.mxu3 %v902_v21  ;;  %1042 = vmatpush.bf16.msra.mxu1 %v902_v21  ;;  %v922_v15 = vpack.c.bf16 %v855_v7, %v854_v6  ;;  %v600_v21 = vmul.f32 %v2136_v4, %v450_v2  ;;  %v684_v2 = vmul.f32 %v2136_v4, %v534_v44 }
  0x78   : > { %v606_v6 = vmul.f32 %v2136_v4, %v456_v52  ;;  %v612_v7 = vmul.f32 %v2136_v4, %v462_v53  ;;  %v364_v52 = vld [vmem:[%s2053_s0 + $0x1e0] sm:$0xff]  ;;  %v367_v53 = vld [vmem:[%s2053_s0 + $0x1f8] sm:$0xff] }
  0x79   : > { %1004 = vmatmul.bf16.vlgmr.msra.gmra.mxu2 %v762_v31  ;;  %974 = vmatmul.bf16.vlgmr.msra.gmra.mxu0 %v726_v32  ;;  %v732_v29 = vpack.c.bf16 %v600_v21, %v594_v20  ;;  %v352_v32 = vld [vmem:[%s2053_s0 + $0x180] sm:$0xff] }
  0x7a   : > { %1104 = vmatpush.bf16.msrb.mxu2 %v917_v26  ;;  %1073 = vmatmul.bf16.vlgmr.msra.gmra.mxu3 %v763_v36  ;;  %v601_v26 = vmul.f32 %v2138_v5, %v451_v11  ;;  %v836_v36 = vld [vmem:[%s2064_s10 + $0x130] sm:$0xff]  ;;  %v529_v45 = vunpack.c.h.bf16 %v352_v32  ;;  %v867_v20 = vld [vmem:[%s2064_s10 + $0x228] sm:$0xff] }
  0x7b   : > { %1173 = vmatpush.bf16.msrb.mxu3 %v925_v27  ;;  %1043 = vmatmul.bf16.vlgmr.msra.gmra.mxu1 %v727_v37  ;;  %v930_v27 = vpack.c.bf16 %v871_v17, %v870_v16  ;;  %v837_v37 = vld [vmem:[%s2064_s10 + $0x138] sm:$0xff]  ;;  %v832_v21 = vld [vmem:[%s2064_s10 + $0x110] sm:$0xff]  ;;  %v928_v22 = vpack.c.bf16 %v867_v20, %v866_v19 }
  0x7c   : > { %1242 = vmatpush.bf16.msrb.mxu0 %v933_v38  ;;  %1311 = vmatpush.bf16.msrb.mxu1 %v941_v39  ;;  %v733_v31 = vpack.c.bf16 %v601_v26, %v595_v25  ;;  %v886_v38 = vld [vmem:[%s2064_s10 + $0x2c0] sm:$0xff]  ;;  %v528_v39 = vunpack.c.l.bf16 %v352_v32  ;;  %v913_v40 = vpack.c.bf16 %v837_v37, %v836_v36  ;;  %v679_v3 = vmul.f32 %v2138_v5, %v529_v45  ;;  %v361_v16 = vld [vmem:[%s2053_s0 + $0x1c8] sm:$0xff]  ;;  %v883_v26 = vld [vmem:[%s2064_s10 + $0x2a8] sm:$0xff] }
  0x7d   : > { %v938_v46 = vpack.c.bf16 %v887_v41, %v886_v38  ;;  %v322_v17 = vld [vmem:[%s2053_s0 + $0x90] sm:$0xff]  ;;  %v546_v32 = vunpack.c.l.bf16 %v361_v16  ;;  %v547_v37 = vunpack.c.h.bf16 %v361_v16 }
  0x7e   : > { %1105 = vmatpush.bf16.msrb.mxu2 %v916_v42  ;;  %v852_v42 = vld [vmem:[%s2064_s10 + $0x1b0] sm:$0xff]  ;;  %v678_v1 = vmul.f32 %v2136_v4, %v528_v39  ;;  %v882_v25 = vld [vmem:[%s2064_s10 + $0x2a0] sm:$0xff]  ;;  %v468_v33 = vunpack.c.l.bf16 %v322_v17  ;;  %v469_v38 = vunpack.c.h.bf16 %v322_v17  ;;  %v475_v39 = vunpack.c.h.bf16 %v325_v18 }
  0x7f   : > { %1174 = vmatpush.bf16.msrb.mxu3 %v924_v43  ;;  %v853_v43 = vld [vmem:[%s2064_s10 + $0x1b8] sm:$0xff]  ;;  %v696_v41 = vmul.f32 %v2136_v4, %v546_v32  ;;  %v697_v45 = vmul.f32 %v2138_v5, %v547_v37 }
  0x80   : > { %1243 = vmatpush.bf16.msrb.mxu0 %v932_v54  ;;  %1312 = vmatpush.bf16.msrb.mxu1 %v940_v55  ;;  %v921_v47 = vpack.c.bf16 %v853_v43, %v852_v42  ;;  %v929_v54 = vpack.c.bf16 %v869_v49, %v868_v48  ;;  %v835_v55 = vld [vmem:[%s2064_s10 + $0x128] sm:$0xff]  ;;  %v774_v11 = vpack.c.bf16 %v684_v2, %v678_v1  ;;  %v373_v37 = vld [vmem:[%s2053_s0 + $0x228] sm:$0xff] }
  0x81   : > { %v912_v60 = vpack.c.bf16 %v835_v55, %v834_v50  ;;  %v618_v42 = vmul.f32 %v2136_v4, %v468_v33  ;;  %v331_v55 = vld [vmem:[%s2053_s0 + $0xd8] sm:$0xff] }
  0x82   : > { %1106 = vmatpush.bf16.msrb.mxu2 %v915_v58  ;;  %v457_v58 = vunpack.c.h.bf16 %v316_v34  ;;  %v474_v34 = vunpack.c.l.bf16 %v325_v18  ;;  %v486_v2 = vunpack.c.l.bf16 %v331_v55 }
  0x83   : > { %1175 = vmatpush.bf16.msrb.mxu3 %v923_v59  ;;  %v463_v59 = vunpack.c.h.bf16 %v319_v35 }
  0x84   : > { %1244 = vmatpush.bf16.msrb.mxu0 %v931_v12  ;;  %1313 = vmatpush.bf16.msrb.mxu1 %v939_v13  ;;  %v607_v9 = vmul.f32 %v2138_v5, %v457_v58  ;;  %v738_v12 = vpack.c.bf16 %v612_v7, %v606_v6  ;;  %v775_v13 = vpack.c.bf16 %v685_v8, %v679_v3  ;;  %v830_v58 = vld [vmem:[%s2064_s10 + $0x100] sm:$0xff]  ;;  %v847_v8 = vld [vmem:[%s2064_s10 + $0x188] sm:$0xff] }
  0x85   : > { %v613_v10 = vmul.f32 %v2138_v5, %v463_v59  ;;  %v624_v43 = vmul.f32 %v2136_v4, %v474_v34  ;;  %v552_v59 = vunpack.c.l.bf16 %v364_v52  ;;  %v910_v3 = vpack.c.bf16 %v831_v62, %v830_v58  ;;  %v846_v7 = vld [vmem:[%s2064_s10 + $0x180] sm:$0xff] }
  0x86   : > { %1107 = vmatpush.bf16.msrb.mxu2 %v914_v14  ;;  %v636_v20 = vmul.f32 %v2136_v4, %v486_v2  ;;  %v878_v34 = vld [vmem:[%s2064_s10 + $0x280] sm:$0xff] }
  0x87   : > { %1176 = vmatpush.bf16.msrb.mxu3 %v922_v15  ;;  %v739_v14 = vpack.c.bf16 %v613_v10, %v607_v9  ;;  %v358_v15 = vld [vmem:[%s2053_s0 + $0x1b0] sm:$0xff]  ;;  %v744_v49 = vpack.c.bf16 %v624_v43, %v618_v42  ;;  %v553_v10 = vunpack.c.h.bf16 %v364_v52  ;;  %v702_v17 = vmul.f32 %v2136_v4, %v552_v59  ;;  %v337_v42 = vld [vmem:[%s2053_s0 + $0x108] sm:$0xff] }
  0x88   : > { %1245 = vmatpush.bf16.msrb.mxu0 %v930_v27  ;;  %1314 = vmatpush.bf16.msrb.mxu1 %v938_v46  ;;  %v540_v27 = vunpack.c.l.bf16 %v358_v15  ;;  %v541_v36 = vunpack.c.h.bf16 %v358_v15  ;;  %v619_v46 = vmul.f32 %v2138_v5, %v469_v38  ;;  %v862_v9 = vld [vmem:[%s2064_s10 + $0x200] sm:$0xff]  ;;  %v487_v15 = vunpack.c.h.bf16 %v331_v55 }
  0x89   : > { %1009 = vmatmul.bf16.gmra.mxu2 %v768_v28  ;;  %979 = vmatmul.bf16.gmra.mxu0 %v732_v29  ;;  %v911_v28 = vpack.c.bf16 %v833_v23, %v832_v21  ;;  %v936_v29 = vpack.c.bf16 %v883_v26, %v882_v25  ;;  %v703_v21 = vmul.f32 %v2138_v5, %v553_v10 }
  0x8a   : > { %1078 = vmatmul.bf16.gmra.mxu3 %v769_v30  ;;  %1108 = vmatpush.bf16.msrb.mxu2 %v913_v40  ;;  %v848_v30 = vld [vmem:[%s2064_s10 + $0x190] sm:$0xff]  ;;  %v690_v40 = vmul.f32 %v2136_v4, %v540_v27  ;;  %v691_v44 = vmul.f32 %v2138_v5, %v541_v36  ;;  %v637_v25 = vmul.f32 %v2138_v5, %v487_v15  ;;  %v370_v36 = vld [vmem:[%s2053_s0 + $0x210] sm:$0xff] }
  0x8b   : > { %1048 = vmatmul.bf16.gmra.mxu1 %v733_v31  ;;  %1177 = vmatpush.bf16.msrb.mxu3 %v921_v47  ;;  %v849_v31 = vld [vmem:[%s2064_s10 + $0x198] sm:$0xff]  ;;  %v625_v47 = vmul.f32 %v2138_v5, %v475_v39  ;;  %v564_v43 = vunpack.c.l.bf16 %v370_v36 }
  0x8c   : > { %1246 = vmatpush.bf16.msrb.mxu0 %v929_v54  ;;  %1315 = vmatpush.bf16.msrb.mxu1 %v937_v61  ;;  %v919_v35 = vpack.c.bf16 %v849_v31, %v848_v30  ;;  %v780_v48 = vpack.c.bf16 %v696_v41, %v690_v40  ;;  %v781_v50 = vpack.c.bf16 %v697_v45, %v691_v44  ;;  %v328_v54 = vld [vmem:[%s2053_s0 + $0xc0] sm:$0xff]  ;;  %v382_v30 = vperm.slane %v2114_v24, 4  ;;  %v334_v41 = vld [vmem:[%s2053_s0 + $0xf0] sm:$0xff] }
  0x8d   : > { %v745_v51 = vpack.c.bf16 %v625_v47, %v619_v46  ;;  %v927_v61 = vpack.c.bf16 %v865_v57, %v864_v56  ;;  %v480_v1 = vunpack.c.l.bf16 %v328_v54  ;;  %v383_v31 = vperm.slane %v2114_v24, 5  ;;  %v306_v15 = vld [vmem:[%s2053_s0 + $0x10] sm:$0xff] }
  0x8e   : > { %1109 = vmatpush.bf16.msrb.mxu2 %v912_v60  ;;  %v558_v60 = vunpack.c.l.bf16 %v367_v53  ;;  %v570_v44 = vunpack.c.l.bf16 %v373_v37  ;;  %v565_v45 = vunpack.c.h.bf16 %v370_v36  ;;  %v492_v46 = vunpack.c.l.bf16 %v334_v41 }
  0x8f   : > { %1178 = vmatpush.bf16.msrb.mxu3 %v920_v0  ;;  %v881_v0 = vld [vmem:[%s2064_s10 + $0x298] sm:$0xff]  ;;  %v630_v19 = vmul.f32 %v2136_v4, %v480_v1  ;;  %v392_v40 = vpack.c.bf16 %v383_v31, %v382_v30  ;;  %v498_v47 = vunpack.c.l.bf16 %v337_v42 }
  0x90   : > { %1247 = vmatpush.bf16.msrb.mxu0 %v928_v22  ;;  %1316 = vmatpush.bf16.msrb.mxu1 %v936_v29  ;;  %v935_v6 = vpack.c.bf16 %v881_v0, %v880_v63  ;;  %v708_v18 = vmul.f32 %v2136_v4, %v558_v60  ;;  %v381_v29 = vperm.slane %v2114_v24, 3  ;;  %v720_v55 = vmul.f32 %v2136_v4, %v570_v44  ;;  %v314_v44 = vld [vmem:[%s2053_s0 + $0x50] sm:$0xff] }
  0x91   : > { %v750_v27 = vpack.c.bf16 %v636_v20, %v630_v19  ;;  %v715_v56 = vmul.f32 %v2138_v5, %v565_v45  ;;  %v642_v58 = vmul.f32 %v2136_v4, %v492_v46  ;;  %v648_v59 = vmul.f32 %v2136_v4, %v498_v47  ;;  %v312_v45 = vld [vmem:[%s2053_s0 + $0x40] sm:$0xff] }
  0x92   : > { %1110 = vmatpush.bf16.msrb.mxu2 %v911_v28  ;;  %v786_v26 = vpack.c.bf16 %v708_v18, %v702_v17  ;;  %v380_v28 = vperm.slane %v2114_v24, 2  ;;  %v571_v24 = vunpack.c.h.bf16 %v373_v37  ;;  %v452_v47 = vunpack.c.l.bf16 %v314_v44 }
  0x93   : > { %1179 = vmatpush.bf16.msrb.mxu3 %v919_v35  ;;  %v879_v35 = vld [vmem:[%s2064_s10 + $0x288] sm:$0xff] }
  0x94   : > { %1248 = vmatpush.bf16.msrb.mxu0 %v927_v61  ;;  %1317 = vmatpush.bf16.msrb.mxu1 %v935_v6  ;;  %v391_v38 = vpack.c.bf16 %v381_v29, %v380_v28  ;;  %v934_v39 = vpack.c.bf16 %v879_v35, %v878_v34  ;;  %v721_v57 = vmul.f32 %v2138_v5, %v571_v24  ;;  %v437_v28 = vunpack.c.h.bf16 %v306_v15  ;;  %v315_v24 = vld [vmem:[%s2053_s0 + $0x58] sm:$0xff] }
  0x96   : > { %1111 = vmatpush.bf16.msrb.mxu2 %v910_v3  ;;  %v399_v52 = vunpack.c.h.b16 %v391_v38  ;;  %v756_v3 = vpack.c.bf16 %v648_v59, %v642_v58 }
  0x98   : > { %1318 = vmatpush.bf16.msrb.mxu1 %v934_v39  ;;  %v405_v0 = vpack.c.b16 %v399_v52, %v399_v52  ;;  %v449_v52 = vunpack.c.h.bf16 %v312_v45 }
  0x99   : > { %1014 = vmatmul.bf16.gmra.mxu2 %v774_v11  ;;  %984 = vmatmul.bf16.gmra.mxu0 %v738_v12  ;;  %v918_v11 = vpack.c.bf16 %v847_v8, %v846_v7  ;;  %v863_v12 = vld [vmem:[%s2064_s10 + $0x208] sm:$0xff]  ;;  %v793_v8 = vpack.c.bf16 %v721_v57, %v715_v56 }
  0x9a   : > { %1083 = vmatmul.bf16.gmra.mxu3 %v775_v13  ;;  %v559_v13 = vunpack.c.h.bf16 %v367_v53  ;;  %v926_v16 = vpack.c.bf16 %v863_v12, %v862_v9  ;;  %v401_v53 = vunpack.c.h.b16 %v392_v40  ;;  %v421_v10 = vpack.i.b16 %v405_v0, %v405_v0  ;;  %v308_v12 = vld [vmem:[%s2053_s0 + $0x20] sm:$0xff] }
  0x9b   : > { %1053 = vmatmul.bf16.gmra.mxu1 %v739_v14  ;;  %v481_v14 = vunpack.c.h.bf16 %v328_v54  ;;  %1180 = vmatpush.bf16.msrb.mxu3 %v918_v11  ;;  %v714_v54 = vmul.f32 %v2136_v4, %v564_v43  ;;  %v305_v11 = vld [vmem:[%s2053_s0 + $0x8] sm:$0xff]  ;;  %v440_v19 = vunpack.c.l.bf16 %v308_v12  ;;  %v311_v43 = vld [vmem:[%s2053_s0 + $0x38] sm:$0xff] }
  0x9c   : > { %1249 = vmatpush.bf16.msrb.mxu0 %v926_v16  ;;  %v709_v22 = vmul.f32 %v2138_v5, %v559_v13  ;;  %v407_v1 = vpack.c.b16 %v401_v53, %v401_v53  ;;  %v309_v16 = vld [vmem:[%s2053_s0 + $0x28] sm:$0xff]  ;;  %v434_v18 = vunpack.c.l.bf16 %v305_v11  ;;  %v435_v20 = vunpack.c.h.bf16 %v305_v11 }
  0x9d   : > { %v631_v23 = vmul.f32 %v2138_v5, %v481_v14  ;;  %v792_v2 = vpack.c.bf16 %v720_v55, %v714_v54  ;;  %v443_v29 = vunpack.c.h.bf16 %v309_v16  ;;  %v446_v46 = vunpack.c.l.bf16 %v311_v43 }
  0x9e   : > { %v787_v32 = vpack.c.bf16 %v709_v22, %v703_v21  ;;  %v429_v4 = vpack.i.b16 %v407_v1, %v407_v1  ;;  %v441_v21 = vunpack.c.h.bf16 %v308_v12  ;;  %v455_v53 = vunpack.c.h.bf16 %v315_v24 }
  0x9f   : > { %v751_v33 = vpack.c.bf16 %v637_v25, %v631_v23  ;;  %v436_v23 = vunpack.c.l.bf16 %v306_v15  ;;  %v442_v25 = vunpack.c.l.bf16 %v309_v16 }
  0xa0   : > { %v431_v17 = vperm.slane %v429_v4, 0 }
  0xa2   : > { %v2288_v30 = vunpack.c.l.bf16 %v431_v17 }
  0xa4   : > { %v587_v37 = vmul.f32 %v2288_v30, %v437_v28 }
  0xa9   : > { %1019 = vmatmul.bf16.gmra.mxu2 %v780_v48  ;;  %989 = vmatmul.bf16.gmra.mxu0 %v744_v49  ;;  %v398_v48 = vunpack.c.l.b16 %v391_v38  ;;  %v400_v49 = vunpack.c.l.b16 %v392_v40  ;;  %v593_v38 = vmul.f32 %v2288_v30, %v443_v29 }
  0xaa   : > { %1088 = vmatmul.bf16.gmra.mxu3 %v781_v50  ;;  %v493_v50 = vunpack.c.h.bf16 %v334_v41 }
  0xab   : > { %1058 = vmatmul.bf16.gmra.mxu1 %v745_v51  ;;  %v499_v51 = vunpack.c.h.bf16 %v337_v42  ;;  %v404_v60 = vpack.c.b16 %v398_v48, %v398_v48  ;;  %v406_v61 = vpack.c.b16 %v400_v49, %v400_v49  ;;  %v731_v42 = vpack.c.bf16 %v593_v38, %v587_v37  ;;  %v327_v37 = vld [vmem:[%s2053_s0 + $0xb8] sm:$0xff] }
  0xac   : > { %v643_v62 = vmul.f32 %v2138_v5, %v493_v50  ;;  %v448_v48 = vunpack.c.l.bf16 %v312_v45  ;;  %v454_v49 = vunpack.c.l.bf16 %v315_v24  ;;  %v447_v50 = vunpack.c.h.bf16 %v311_v43 }
  0xad   : > { %v649_v63 = vmul.f32 %v2138_v5, %v499_v51  ;;  %v417_v6 = vpack.i.b16 %v404_v60, %v404_v60  ;;  %v425_v7 = vpack.i.b16 %v406_v61, %v406_v61  ;;  %v423_v5 = vperm.slane %v421_v10, 0 }
  0xae   : > { %v453_v51 = vunpack.c.h.bf16 %v314_v44  ;;  %v599_v60 = vmul.f32 %v2288_v30, %v449_v52  ;;  %v605_v61 = vmul.f32 %v2288_v30, %v455_v53  ;;  %v478_v44 = vunpack.c.l.bf16 %v327_v37 }
  0xaf   : > { %v757_v9 = vpack.c.bf16 %v649_v63, %v643_v62  ;;  %v419_v13 = vperm.slane %v417_v6, 0  ;;  %v427_v14 = vperm.slane %v425_v7, 0  ;;  %v318_v6 = vld [vmem:[%s2053_s0 + $0x70] sm:$0xff]  ;;  %v321_v7 = vld [vmem:[%s2053_s0 + $0x88] sm:$0xff] }
  0xb0   : > { %v737_v1 = vpack.c.bf16 %v605_v61, %v599_v60  ;;  %v460_v10 = vunpack.c.l.bf16 %v318_v6  ;;  %v466_v4 = vunpack.c.l.bf16 %v321_v7 }
  0xb1   : > { %v2282_v22 = vunpack.c.l.bf16 %v419_v13  ;;  %v461_v13 = vunpack.c.h.bf16 %v318_v6 }
  0xb3   : > { %v584_v31 = vmul.f32 %v2282_v22, %v434_v18  ;;  %v596_v54 = vmul.f32 %v2282_v22, %v446_v46  ;;  %v602_v55 = vmul.f32 %v2282_v22, %v452_v47 }
  0xb5   : > { %v734_v62 = vpack.c.bf16 %v602_v55, %v596_v54 }
  0xb9   : > { %1024 = vmatmul.bf16.gmra.mxu2 %v786_v26  ;;  %994 = vmatmul.bf16.gmra.mxu0 %v750_v27  ;;  %v2284_v26 = vunpack.c.l.bf16 %v427_v14  ;;  %v2286_v27 = vunpack.c.l.bf16 %v423_v5  ;;  %v467_v14 = vunpack.c.h.bf16 %v321_v7  ;;  %v329_v7 = vld [vmem:[%s2053_s0 + $0xc8] sm:$0xff] }
  0xba   : > { %1093 = vmatmul.bf16.gmra.mxu3 %v787_v32  ;;  %v590_v32 = vmul.f32 %v2282_v22, %v440_v19 }
  0xbb   : > { %1063 = vmatmul.bf16.gmra.mxu1 %v751_v33  ;;  %v586_v33 = vmul.f32 %v2284_v26, %v436_v23  ;;  %v592_v34 = vmul.f32 %v2284_v26, %v442_v25  ;;  %v585_v35 = vmul.f32 %v2286_v27, %v435_v20  ;;  %v591_v36 = vmul.f32 %v2286_v27, %v441_v21 }
  0xbc   : > { %v728_v39 = vpack.c.bf16 %v590_v32, %v584_v31  ;;  %v598_v56 = vmul.f32 %v2284_v26, %v448_v48  ;;  %v604_v57 = vmul.f32 %v2284_v26, %v454_v49  ;;  %v597_v58 = vmul.f32 %v2286_v27, %v447_v50 }
  0xbd   : > { %v730_v40 = vpack.c.bf16 %v592_v34, %v586_v33  ;;  %v729_v41 = vpack.c.bf16 %v591_v36, %v585_v35  ;;  %v603_v59 = vmul.f32 %v2286_v27, %v453_v51  ;;  %v610_v16 = vmul.f32 %v2284_v26, %v460_v10  ;;  %v323_v34 = vld [vmem:[%s2053_s0 + $0x98] sm:$0xff]  ;;  %v326_v35 = vld [vmem:[%s2053_s0 + $0xb0] sm:$0xff]  ;;  %v324_v36 = vld [vmem:[%s2053_s0 + $0xa0] sm:$0xff] }
  0xbe   : > { %v736_v63 = vpack.c.bf16 %v604_v57, %v598_v56  ;;  %v616_v17 = vmul.f32 %v2284_v26, %v466_v4  ;;  %v611_v20 = vmul.f32 %v2288_v30, %v461_v13  ;;  %v617_v21 = vmul.f32 %v2288_v30, %v467_v14  ;;  %v333_v10 = vld [vmem:[%s2053_s0 + $0xe8] sm:$0xff] }
  0xbf   : > { %v735_v0 = vpack.c.bf16 %v603_v59, %v597_v58  ;;  %v472_v43 = vunpack.c.l.bf16 %v324_v36  ;;  %v477_v46 = vunpack.c.h.bf16 %v326_v35  ;;  %v473_v47 = vunpack.c.h.bf16 %v324_v36 }
  0xc0   : > { %v742_v25 = vpack.c.bf16 %v616_v17, %v610_v16  ;;  %v743_v31 = vpack.c.bf16 %v617_v21, %v611_v20  ;;  %v479_v48 = vunpack.c.h.bf16 %v327_v37  ;;  %v628_v54 = vmul.f32 %v2284_v26, %v478_v44 }
  0xc1   : > { %v622_v53 = vmul.f32 %v2284_v26, %v472_v43  ;;  %v627_v56 = vmul.f32 %v2286_v27, %v477_v46  ;;  %v623_v57 = vmul.f32 %v2288_v30, %v473_v47  ;;  %v483_v14 = vunpack.c.h.bf16 %v329_v7  ;;  %v335_v47 = vld [vmem:[%s2053_s0 + $0xf8] sm:$0xff] }
  0xc2   : > { %v629_v58 = vmul.f32 %v2288_v30, %v479_v48  ;;  %v491_v20 = vunpack.c.h.bf16 %v333_v10  ;;  %v338_v48 = vld [vmem:[%s2053_s0 + $0x110] sm:$0xff] }
  0xc4   : > { %v641_v36 = vmul.f32 %v2288_v30, %v491_v20 }
  0xc9   : > { %1029 = vmatmul.bf16.gmra.mxu2 %v792_v2  ;;  %999 = vmatmul.bf16.gmra.mxu0 %v756_v3  ;;  %v317_v2 = vld [vmem:[%s2053_s0 + $0x68] sm:$0xff]  ;;  %v320_v3 = vld [vmem:[%s2053_s0 + $0x80] sm:$0xff] }
  0xca   : > { %1098 = vmatmul.bf16.gmra.mxu3 %v793_v8  ;;  %v458_v8 = vunpack.c.l.bf16 %v317_v2  ;;  %v459_v11 = vunpack.c.h.bf16 %v317_v2  ;;  %v465_v12 = vunpack.c.h.bf16 %v320_v3  ;;  %v749_v2 = vpack.c.bf16 %v629_v58, %v623_v57 }
  0xcb   : > { %1068 = vmatmul.bf16.gmra.mxu1 %v757_v9  ;;  %v464_v9 = vunpack.c.l.bf16 %v320_v3 }
  0xcc   : > { %v608_v5 = vmul.f32 %v2282_v22, %v458_v8  ;;  %v609_v18 = vmul.f32 %v2286_v27, %v459_v11  ;;  %v615_v19 = vmul.f32 %v2286_v27, %v465_v12  ;;  %v332_v8 = vld [vmem:[%s2053_s0 + $0xe0] sm:$0xff]  ;;  %v482_v11 = vunpack.c.l.bf16 %v329_v7 }
  0xcd   : > { %v614_v15 = vmul.f32 %v2282_v22, %v464_v9  ;;  %v330_v9 = vld [vmem:[%s2053_s0 + $0xd0] sm:$0xff]  ;;  %v488_v13 = vunpack.c.l.bf16 %v332_v8 }
  0xce   : > { %v741_v29 = vpack.c.bf16 %v615_v19, %v609_v18  ;;  %v489_v18 = vunpack.c.h.bf16 %v332_v8  ;;  %v485_v19 = vunpack.c.h.bf16 %v330_v9 }
  0xcf   : > { %v740_v23 = vpack.c.bf16 %v614_v15, %v608_v5  ;;  %v484_v5 = vunpack.c.l.bf16 %v330_v9  ;;  %v490_v15 = vunpack.c.l.bf16 %v333_v10 }
  0xd9   : > { %1112 = vmatmul.bf16.vlgmr.msrb.gmra.mxu2 %v728_v39  ;;  %1250 = vmatmul.bf16.vlgmr.msrb.gmra.mxu0 %v730_v40  ;;  %v470_v39 = vunpack.c.l.bf16 %v323_v34 }
  0xda   : > { %1181 = vmatmul.bf16.vlgmr.msrb.gmra.mxu3 %v729_v41  ;;  %v476_v41 = vunpack.c.l.bf16 %v326_v35  ;;  %v635_v35 = vmul.f32 %v2288_v30, %v485_v19 }
  0xdb   : > { %1319 = vmatmul.bf16.vlgmr.msrb.gmra.mxu1 %v731_v42  ;;  %v471_v42 = vunpack.c.h.bf16 %v323_v34  ;;  %v620_v51 = vmul.f32 %v2282_v22, %v470_v39  ;;  %v639_v34 = vmul.f32 %v2286_v27, %v489_v18 }
  0xdc   : > { %v626_v52 = vmul.f32 %v2282_v22, %v476_v41  ;;  %v755_v44 = vpack.c.bf16 %v641_v36, %v635_v35 }
  0xdd   : > { %v621_v55 = vmul.f32 %v2286_v27, %v471_v42 }
  0xde   : > { %v746_v61 = vpack.c.bf16 %v626_v52, %v620_v51  ;;  %v339_v51 = vld [vmem:[%s2053_s0 + $0x118] sm:$0xff] }
  0xdf   : > { %v502_v58 = vunpack.c.l.bf16 %v339_v51 }
  0xe1   : > { %v652_v9 = vmul.f32 %v2284_v26, %v502_v58 }
  0xe9   : > { %1117 = vmatmul.bf16.gmra.mxu2 %v734_v62  ;;  %1255 = vmatmul.bf16.gmra.mxu0 %v736_v63  ;;  %v748_v62 = vpack.c.bf16 %v628_v54, %v622_v53  ;;  %v494_v53 = vunpack.c.l.bf16 %v335_v47 }
  0xea   : > { %1186 = vmatmul.bf16.gmra.mxu3 %v735_v0 }
  0xeb   : > { %1324 = vmatmul.bf16.gmra.mxu1 %v737_v1  ;;  %v747_v1 = vpack.c.bf16 %v627_v56, %v621_v55  ;;  %v500_v55 = vunpack.c.l.bf16 %v338_v48  ;;  %v495_v56 = vunpack.c.h.bf16 %v335_v47 }
  0xed   : > { %v650_v7 = vmul.f32 %v2282_v22, %v500_v55  ;;  %v645_v10 = vmul.f32 %v2286_v27, %v495_v56 }
  0xf6   : > { %v975_v28 = vpop.f32.mrf.mxu0 }
  0xf8   : > { %v1044_v32 = vpop.f32.mrf.mxu1 }
  0xf9   : > { %v2322_v33 = vadd.f32 %v1044_v32, %v975_v28  ;;  %1122 = vmatmul.bf16.gmra.mxu2 %v740_v23  ;;  %1260 = vmatmul.bf16.gmra.mxu0 %v742_v25  ;;  %v632_v25 = vmul.f32 %v2282_v22, %v482_v11  ;;  %v638_v28 = vmul.f32 %v2282_v22, %v488_v13 }
  0xfa   : > { %1191 = vmatmul.bf16.gmra.mxu3 %v741_v29  ;;  %v634_v29 = vmul.f32 %v2284_v26, %v484_v5  ;;  %v633_v32 = vmul.f32 %v2286_v27, %v483_v14 }
  0xfb   : > { %1329 = vmatmul.bf16.gmra.mxu1 %v743_v31  ;;  %v640_v31 = vmul.f32 %v2284_v26, %v490_v15  ;;  %v752_v39 = vpack.c.bf16 %v638_v28, %v632_v25  ;;  %v341_v28 = vld [vmem:[%s2053_s0 + $0x128] sm:$0xff] }
  0xfc   : > { %v1005_v38 = vpop.f32.mrf.mxu2  ;;  %v753_v43 = vpack.c.bf16 %v639_v34, %v633_v32  ;;  %v345_v32 = vld [vmem:[%s2053_s0 + $0x148] sm:$0xff]  ;;  %v506_v35 = vunpack.c.l.bf16 %v341_v28 }
  0xfd   : > { %v1074_v40 = vpop.f32.mrf.mxu3  ;;  %v515_v47 = vunpack.c.h.bf16 %v345_v32 }
  0xfe   : > { %v2328_v45 = vadd.f32 %v1074_v40, %v1005_v38  ;;  %v977_v24 = vpop.f32.mrf.mxu0  ;;  %v754_v40 = vpack.c.bf16 %v640_v31, %v634_v29  ;;  %v344_v29 = vld [vmem:[%s2053_s0 + $0x140] sm:$0xff]  ;;  %v342_v31 = vld [vmem:[%s2053_s0 + $0x130] sm:$0xff] }
  0xff   : > { %v665_v58 = vmul.f32 %v2288_v30, %v515_v47 }
 0x100   : > { %v1046_v49 = vpop.f32.mrf.mxu1 }
 0x101   : > { %v2330_v50 = vadd.f32 %v1046_v49, %v977_v24  ;;  %v336_v49 = vld [vmem:[%s2053_s0 + $0x100] sm:$0xff] }
 0x102   : > { %v496_v57 = vunpack.c.l.bf16 %v336_v49 }
 0x104   : > { %v1007_v59 = vpop.f32.mrf.mxu2  ;;  %v646_v8 = vmul.f32 %v2284_v26, %v496_v57 }
 0x105   : > { %v1076_v60 = vpop.f32.mrf.mxu3 }
 0x106   : > { %v2340_v63 = vadd.f32 %v1076_v60, %v1007_v59  ;;  %v980_v0 = vpop.f32.mrf.mxu0  ;;  %v760_v15 = vpack.c.bf16 %v652_v9, %v646_v8 }
 0x108   : > { %v1049_v3 = vpop.f32.mrf.mxu1 }
 0x109   : > { %v2342_v6 = vadd.f32 %v1049_v3, %v980_v0  ;;  %1127 = vmatmul.bf16.gmra.mxu2 %v746_v61  ;;  %1265 = vmatmul.bf16.gmra.mxu0 %v748_v62  ;;  %v501_v61 = vunpack.c.h.bf16 %v338_v48  ;;  %v497_v62 = vunpack.c.h.bf16 %v336_v49  ;;  %v503_v0 = vunpack.c.h.bf16 %v339_v51 }
 0x10a   : > { %1196 = vmatmul.bf16.gmra.mxu3 %v747_v1  ;;  %v644_v3 = vmul.f32 %v2282_v22, %v494_v53  ;;  %v656_v51 = vmul.f32 %v2282_v22, %v506_v35 }
 0x10b   : > { %1334 = vmatmul.bf16.gmra.mxu1 %v749_v2  ;;  %v647_v11 = vmul.f32 %v2288_v30, %v497_v62 }
 0x10c   : > { %v1010_v4 = vpop.f32.mrf.mxu2  ;;  %v758_v5 = vpack.c.bf16 %v650_v7, %v644_v3 }
 0x10d   : > { %v1079_v12 = vpop.f32.mrf.mxu3 }
 0x10e   : > { %v2348_v16 = vadd.f32 %v1079_v12, %v1010_v4  ;;  %v982_v17 = vpop.f32.mrf.mxu0  ;;  %v651_v4 = vmul.f32 %v2286_v27, %v501_v61  ;;  %v653_v12 = vmul.f32 %v2288_v30, %v503_v0 }
 0x110   : > { %v1051_v21 = vpop.f32.mrf.mxu1  ;;  %v759_v19 = vpack.c.bf16 %v651_v4, %v645_v10  ;;  %v761_v20 = vpack.c.bf16 %v653_v12, %v647_v11  ;;  %v347_v4 = vld [vmem:[%s2053_s0 + $0x158] sm:$0xff]  ;;  %v350_v11 = vld [vmem:[%s2053_s0 + $0x170] sm:$0xff]  ;;  %v348_v12 = vld [vmem:[%s2053_s0 + $0x160] sm:$0xff] }
 0x111   : > { %v2350_v23 = vadd.f32 %v1051_v21, %v982_v17 }
 0x114   : > { %v1012_v37 = vpop.f32.mrf.mxu2 }
 0x115   : > { %v1081_v38 = vpop.f32.mrf.mxu3 }
 0x116   : > { %v2360_v41 = vadd.f32 %v1081_v38, %v1012_v37  ;;  %v985_v42 = vpop.f32.mrf.mxu0  ;;  %v512_v37 = vunpack.c.l.bf16 %v344_v29  ;;  %v507_v38 = vunpack.c.h.bf16 %v341_v28 }
 0x118   : > { %v1054_v24 = vpop.f32.mrf.mxu1  ;;  %v657_v55 = vmul.f32 %v2286_v27, %v507_v38 }
 0x119   : > { %v2362_v46 = vadd.f32 %v1054_v24, %v985_v42  ;;  %1132 = vmatmul.bf16.gmra.mxu2 %v752_v39  ;;  %1270 = vmatmul.bf16.gmra.mxu0 %v754_v40  ;;  %v508_v39 = vunpack.c.l.bf16 %v342_v31  ;;  %v514_v40 = vunpack.c.l.bf16 %v345_v32  ;;  %v509_v24 = vunpack.c.h.bf16 %v342_v31 }
 0x11a   : > { %1201 = vmatmul.bf16.gmra.mxu3 %v753_v43  ;;  %v525_v31 = vunpack.c.h.bf16 %v350_v11  ;;  %v521_v32 = vunpack.c.h.bf16 %v348_v12 }
 0x11b   : > { %1339 = vmatmul.bf16.gmra.mxu1 %v755_v44  ;;  %v513_v44 = vunpack.c.h.bf16 %v344_v29  ;;  %v658_v53 = vmul.f32 %v2284_v26, %v508_v39  ;;  %v659_v57 = vmul.f32 %v2288_v30, %v509_v24 }
 0x11c   : > { %v1015_v52 = vpop.f32.mrf.mxu2  ;;  %v671_v24 = vmul.f32 %v2288_v30, %v521_v32 }
 0x11d   : > { %v1084_v54 = vpop.f32.mrf.mxu3  ;;  %v663_v56 = vmul.f32 %v2286_v27, %v513_v44  ;;  %v767_v8 = vpack.c.bf16 %v665_v58, %v659_v57  ;;  %v675_v44 = vmul.f32 %v2286_v27, %v525_v31 }
 0x11e   : > { %v2368_v59 = vadd.f32 %v1084_v54, %v1015_v52  ;;  %v987_v60 = vpop.f32.mrf.mxu0  ;;  %v662_v52 = vmul.f32 %v2282_v22, %v512_v37  ;;  %v664_v54 = vmul.f32 %v2284_v26, %v514_v40 }
 0x11f   : > { %v765_v7 = vpack.c.bf16 %v663_v56, %v657_v55 }
 0x120   : > { %v1056_v1 = vpop.f32.mrf.mxu1  ;;  %v764_v62 = vpack.c.bf16 %v662_v52, %v656_v51  ;;  %v766_v0 = vpack.c.bf16 %v664_v54, %v658_v53 }
 0x121   : > { %v2370_v2 = vadd.f32 %v1056_v1, %v987_v60 }
 0x124   : > { %v1017_v13 = vpop.f32.mrf.mxu2 }
 0x125   : > { %v1086_v14 = vpop.f32.mrf.mxu3 }
 0x126   : > { %v2380_v17 = vadd.f32 %v1086_v14, %v1017_v13  ;;  %v990_v18 = vpop.f32.mrf.mxu0  ;;  %v351_v13 = vld [vmem:[%s2053_s0 + $0x178] sm:$0xff] }
 0x128   : > { %v1059_v21 = vpop.f32.mrf.mxu1 }
 0x129   : > { %v2382_v25 = vadd.f32 %v1059_v21, %v990_v18  ;;  %1137 = vmatmul.bf16.gmra.mxu2 %v758_v5  ;;  %1275 = vmatmul.bf16.gmra.mxu0 %v760_v15  ;;  %v518_v5 = vunpack.c.l.bf16 %v347_v4  ;;  %v524_v18 = vunpack.c.l.bf16 %v350_v11  ;;  %v526_v21 = vunpack.c.l.bf16 %v351_v13 }
 0x12a   : > { %1206 = vmatmul.bf16.gmra.mxu3 %v759_v19  ;;  %v519_v19 = vunpack.c.h.bf16 %v347_v4 }
 0x12b   : > { %1344 = vmatmul.bf16.gmra.mxu1 %v761_v20  ;;  %v520_v20 = vunpack.c.l.bf16 %v348_v12  ;;  %v668_v37 = vmul.f32 %v2282_v22, %v518_v5  ;;  %v674_v38 = vmul.f32 %v2282_v22, %v524_v18  ;;  %v676_v40 = vmul.f32 %v2284_v26, %v526_v21 }
 0x12c   : > { %v1020_v34 = vpop.f32.mrf.mxu2 }
 0x12d   : > { %v1089_v36 = vpop.f32.mrf.mxu3  ;;  %v670_v39 = vmul.f32 %v2284_v26, %v520_v20  ;;  %v770_v52 = vpack.c.bf16 %v674_v38, %v668_v37 }
 0x12e   : > { %v2388_v42 = vadd.f32 %v1089_v36, %v1020_v34  ;;  %v992_v43 = vpop.f32.mrf.mxu0  ;;  %v527_v34 = vunpack.c.h.bf16 %v351_v13 }
 0x12f   : > { %v772_v53 = vpack.c.bf16 %v676_v40, %v670_v39 }
 0x130   : > { %v1061_v48 = vpop.f32.mrf.mxu1  ;;  %v677_v47 = vmul.f32 %v2288_v30, %v527_v34 }
 0x131   : > { %v2390_v49 = vadd.f32 %v1061_v48, %v992_v43  ;;  %v669_v43 = vmul.f32 %v2286_v27, %v519_v19 }
 0x132   : > { %v773_v57 = vpack.c.bf16 %v677_v47, %v671_v24 }
 0x133   : > { %v771_v56 = vpack.c.bf16 %v675_v44, %v669_v43 }
 0x134   : > { %v1022_v60 = vpop.f32.mrf.mxu2 }
 0x135   : > { %v1091_v61 = vpop.f32.mrf.mxu3 }
 0x136   : > { %v2400_v1 = vadd.f32 %v1091_v61, %v1022_v60  ;;  %v995_v3 = vpop.f32.mrf.mxu0  ;;  %v353_v61 = vld [vmem:[%s2053_s0 + $0x188] sm:$0xff] }
 0x137   : > { %v531_v11 = vunpack.c.h.bf16 %v353_v61 }
 0x138   : > { %v1064_v9 = vpop.f32.mrf.mxu1 }
 0x139   : > { %v2402_v10 = vadd.f32 %v1064_v9, %v995_v3  ;;  %1142 = vmatmul.bf16.gmra.mxu2 %v764_v62  ;;  %1280 = vmatmul.bf16.gmra.mxu0 %v766_v0  ;;  %v356_v62 = vld [vmem:[%s2053_s0 + $0x1a0] sm:$0xff]  ;;  %v354_v0 = vld [vmem:[%s2053_s0 + $0x190] sm:$0xff]  ;;  %v357_v3 = vld [vmem:[%s2053_s0 + $0x1a8] sm:$0xff] }
 0x13a   : > { %1211 = vmatmul.bf16.gmra.mxu3 %v765_v7  ;;  %v536_v4 = vunpack.c.l.bf16 %v356_v62  ;;  %v532_v12 = vunpack.c.l.bf16 %v354_v0  ;;  %v538_v13 = vunpack.c.l.bf16 %v357_v3  ;;  %v533_v18 = vunpack.c.h.bf16 %v354_v0 }
 0x13b   : > { %1349 = vmatmul.bf16.gmra.mxu1 %v767_v8  ;;  %v530_v8 = vunpack.c.l.bf16 %v353_v61  ;;  %v539_v19 = vunpack.c.h.bf16 %v357_v3 }
 0x13c   : > { %v1025_v14 = vpop.f32.mrf.mxu2  ;;  %v686_v31 = vmul.f32 %v2282_v22, %v536_v4  ;;  %v682_v32 = vmul.f32 %v2284_v26, %v532_v12  ;;  %v688_v34 = vmul.f32 %v2284_v26, %v538_v13  ;;  %v683_v38 = vmul.f32 %v2288_v30, %v533_v18 }
 0x13d   : > { %v1094_v15 = vpop.f32.mrf.mxu3  ;;  %v689_v39 = vmul.f32 %v2288_v30, %v539_v19 }
 0x13e   : > { %v2408_v28 = vadd.f32 %v1094_v15, %v1025_v14  ;;  %v997_v29 = vpop.f32.mrf.mxu0  ;;  %v537_v15 = vunpack.c.h.bf16 %v356_v62  ;;  %v778_v24 = vpack.c.bf16 %v688_v34, %v682_v32  ;;  %v942_v32 = vld [vmem:[#allocation2] sm:$0xff] }
 0x140   : > { %v1066_v35 = vpop.f32.mrf.mxu1  ;;  %v687_v37 = vmul.f32 %v2286_v27, %v537_v15 }
 0x141   : > { %v2410_v36 = vadd.f32 %v1066_v35, %v997_v29  ;;  %v680_v29 = vmul.f32 %v2282_v22, %v530_v8  ;;  %v681_v35 = vmul.f32 %v2286_v27, %v531_v11 }
 0x143   : > { %v776_v44 = vpack.c.bf16 %v686_v31, %v680_v29 }
 0x144   : > { %v1027_v48 = vpop.f32.mrf.mxu2 }
 0x145   : > { %v1096_v51 = vpop.f32.mrf.mxu3 }
 0x146   : > { %v2420_v54 = vadd.f32 %v1096_v51, %v1027_v48  ;;  %v1000_v55 = vpop.f32.mrf.mxu0  ;;  %v777_v51 = vpack.c.bf16 %v687_v37, %v681_v35 }
 0x148   : > { %v1069_v58 = vpop.f32.mrf.mxu1 }
 0x149   : > { %v2422_v60 = vadd.f32 %v1069_v58, %v1000_v55  ;;  %1147 = vmatmul.bf16.gmra.mxu2 %v770_v52  ;;  %1285 = vmatmul.bf16.gmra.mxu0 %v772_v53  ;;  %v779_v52 = vpack.c.bf16 %v689_v39, %v683_v38  ;;  %v359_v55 = vld [vmem:[%s2053_s0 + $0x1b8] sm:$0xff] }
 0x14a   : > { %1216 = vmatmul.bf16.gmra.mxu3 %v771_v56  ;;  %v362_v56 = vld [vmem:[%s2053_s0 + $0x1d0] sm:$0xff]  ;;  %v363_v58 = vld [vmem:[%s2053_s0 + $0x1d8] sm:$0xff]  ;;  %v542_v62 = vunpack.c.l.bf16 %v359_v55  ;;  %v543_v11 = vunpack.c.h.bf16 %v359_v55 }
 0x14b   : > { %1354 = vmatmul.bf16.gmra.mxu1 %v773_v57  ;;  %v360_v57 = vld [vmem:[%s2053_s0 + $0x1c0] sm:$0xff]  ;;  %v549_v12 = vunpack.c.h.bf16 %v362_v56 }
 0x14c   : > { %v1030_v7 = vpop.f32.mrf.mxu2  ;;  %v544_v8 = vunpack.c.l.bf16 %v360_v57  ;;  %v545_v13 = vunpack.c.h.bf16 %v360_v57  ;;  %v692_v19 = vmul.f32 %v2282_v22, %v542_v62  ;;  %v693_v34 = vmul.f32 %v2286_v27, %v543_v11  ;;  %v368_v62 = vld [vmem:[%s2053_s0 + $0x200] sm:$0xff] }
 0x14d   : > { %v1099_v9 = vpop.f32.mrf.mxu3  ;;  %v699_v35 = vmul.f32 %v2286_v27, %v549_v12  ;;  %v560_v11 = vunpack.c.l.bf16 %v368_v62 }
 0x14e   : > { %v2428_v14 = vadd.f32 %v1099_v9, %v1030_v7  ;;  %v1002_v5 = vpop.f32.mrf.mxu0  ;;  %v548_v7 = vunpack.c.l.bf16 %v362_v56  ;;  %v550_v9 = vunpack.c.l.bf16 %v363_v58  ;;  %v694_v31 = vmul.f32 %v2284_v26, %v544_v8 }
 0x14f   : > { %v695_v37 = vmul.f32 %v2288_v30, %v545_v13  ;;  %v783_v55 = vpack.c.bf16 %v699_v35, %v693_v34 }
 0x150   : > { %v1071_v20 = vpop.f32.mrf.mxu1  ;;  %v698_v29 = vmul.f32 %v2282_v22, %v548_v7 }
 0x151   : > { %v2430_v21 = vadd.f32 %v1071_v20, %v1002_v5  ;;  %v551_v5 = vunpack.c.h.bf16 %v363_v58 }
 0x153   : > { %v701_v38 = vmul.f32 %v2288_v30, %v551_v5 }
 0x154   : > { %v1032_v40 = vpop.f32.mrf.mxu2 }
 0x155   : > { %v1101_v43 = vpop.f32.mrf.mxu3  ;;  %v785_v56 = vpack.c.bf16 %v701_v38, %v695_v37  ;;  %v710_v37 = vmul.f32 %v2282_v22, %v560_v11  ;;  %v375_v11 = vld [vmem:[%s2053_s0 + $0x238] sm:$0xff] }
 0x156   : > { %v2440_v47 = vadd.f32 %v1101_v43, %v1032_v40  ;;  %v1251_v48 = vpop.f32.mrf.mxu0 }
 0x158   : > { %v1320_v53 = vpop.f32.mrf.mxu1 }
 0x159   : > { %1152 = vmatmul.bf16.gmra.mxu2 %v776_v44  ;;  %1290 = vmatmul.bf16.gmra.mxu0 %v778_v24 }
 0x15a   : > { %1221 = vmatmul.bf16.gmra.mxu3 %v777_v51 }
 0x15b   : > { %1359 = vmatmul.bf16.gmra.mxu1 %v779_v52 }
 0x15c   : > { %v1113_v61 = vpop.f32.mrf.mxu2 }
 0x15d   : > { %v1114_v0 = vadd.f32 %v1113_v61, %v2322_v33  ;;  %v1182_v3 = vpop.f32.mrf.mxu3  ;;  %v700_v33 = vmul.f32 %v2284_v26, %v550_v9  ;;  %v365_v61 = vld [vmem:[%s2053_s0 + $0x1e8] sm:$0xff] }
 0x15e   : > { %v1253_v4 = vpop.f32.mrf.mxu0  ;;  %v554_v9 = vunpack.c.l.bf16 %v365_v61 }
 0x15f   : > { %v1183_v15 = vadd.f32 %v1182_v3, %v1114_v0  ;;  %v784_v51 = vpack.c.bf16 %v700_v33, %v694_v31  ;;  %v943_v0 = vld [vmem:[#allocation2 + $0x8] sm:$0xff]  ;;  %v369_v3 = vld [vmem:[%s2053_s0 + $0x208] sm:$0xff] }
 0x160   : > { %v1322_v18 = vpop.f32.mrf.mxu1  ;;  %v563_v33 = vunpack.c.h.bf16 %v369_v3 }
 0x161   : > { %v1252_v20 = vadd.f32 %v1251_v48, %v1183_v15  ;;  %v782_v48 = vpack.c.bf16 %v698_v29, %v692_v19  ;;  %v562_v19 = vunpack.c.l.bf16 %v369_v3  ;;  %v561_v29 = vunpack.c.h.bf16 %v368_v62 }
 0x163   : > { %v1321_v39 = vadd.f32 %v1320_v53, %v1252_v20  ;;  %v555_v20 = vunpack.c.h.bf16 %v365_v61 }
 0x164   : > { %v1115_v40 = vpop.f32.mrf.mxu2 }
 0x165   : > { %v1380_v43 = vadd.f32 %v1321_v39, %v942_v32  ;;  %v1116_v44 = vadd.f32 %v1115_v40, %v2330_v50  ;;  %v1184_v24 = vpop.f32.mrf.mxu3  ;;  %v366_v50 = vld [vmem:[%s2053_s0 + $0x1f0] sm:$0xff]  ;;  %v944_v39 = vld [vmem:[#allocation2 + $0x10] sm:$0xff]  ;;  %v705_v40 = vmul.f32 %v2286_v27, %v555_v20 }
 0x166   : > { %v1256_v52 = vpop.f32.mrf.mxu0  ;;  %v556_v15 = vunpack.c.l.bf16 %v366_v50  ;;  %v557_v31 = vunpack.c.h.bf16 %v366_v50 }
 0x167   : > { %1405 = vst.msk [vmem:[#allocation2] sm:$0xff] %vm1404_vm1, %v1380_v43  ;;  %v1185_v57 = vadd.f32 %v1184_v24, %v1116_v44  ;;  %v711_v43 = vmul.f32 %v2286_v27, %v561_v29  ;;  %v713_v24 = vmul.f32 %v2288_v30, %v563_v33  ;;  %v574_v33 = vunpack.c.l.bf16 %v375_v11 }
 0x168   : > { %v1325_v58 = vpop.f32.mrf.mxu1  ;;  %v706_v38 = vmul.f32 %v2284_v26, %v556_v15  ;;  %v707_v44 = vmul.f32 %v2288_v30, %v557_v31 }
 0x169   : > { %v1254_v53 = vadd.f32 %v1253_v4, %v1185_v57  ;;  %1157 = vmatmul.bf16.gmra.mxu2 %v782_v48  ;;  %1295 = vmatmul.bf16.gmra.mxu0 %v784_v51  ;;  %v789_v62 = vpack.c.bf16 %v711_v43, %v705_v40 }
 0x16a   : > { %1226 = vmatmul.bf16.gmra.mxu3 %v783_v55 }
 0x16b   : > { %1364 = vmatmul.bf16.gmra.mxu1 %v785_v56  ;;  %v1323_v7 = vadd.f32 %v1322_v18, %v1254_v53  ;;  %v704_v18 = vmul.f32 %v2282_v22, %v554_v9  ;;  %v945_v9 = vld [vmem:[#allocation2 + $0x18] sm:$0xff] }
 0x16c   : > { %v1118_v8 = vpop.f32.mrf.mxu2 }
 0x16d   : > { %v1381_v12 = vadd.f32 %v1323_v7, %v943_v0  ;;  %v1119_v13 = vadd.f32 %v1118_v8, %v2342_v6  ;;  %v1187_v5 = vpop.f32.mrf.mxu3  ;;  %v712_v6 = vmul.f32 %v2284_v26, %v562_v19  ;;  %v788_v57 = vpack.c.bf16 %v710_v37, %v704_v18  ;;  %v374_v8 = vld [vmem:[%s2053_s0 + $0x230] sm:$0xff] }
 0x16e   : > { %v1258_v4 = vpop.f32.mrf.mxu0  ;;  %v791_v0 = vpack.c.bf16 %v713_v24, %v707_v44  ;;  %v572_v15 = vunpack.c.l.bf16 %v374_v8  ;;  %v573_v18 = vunpack.c.h.bf16 %v374_v8  ;;  %v575_v37 = vunpack.c.h.bf16 %v375_v11  ;;  %v946_v44 = vld [vmem:[#allocation2 + $0x20] sm:$0xff]  ;;  %v947_v8 = vld [vmem:[#allocation2 + $0x28] sm:$0xff] }
 0x16f   : > { %1406 = vst.msk [vmem:[#allocation2 + $0x8] sm:$0xff] %vm1404_vm1, %v1381_v12  ;;  %v1188_v32 = vadd.f32 %v1187_v5, %v1119_v13  ;;  %v790_v53 = vpack.c.bf16 %v712_v6, %v706_v38 }
 0x170   : > { %v1327_v34 = vpop.f32.mrf.mxu1  ;;  %v722_v40 = vmul.f32 %v2282_v22, %v572_v15  ;;  %v948_v15 = vld [vmem:[#allocation2 + $0x30] sm:$0xff] }
 0x171   : > { %v1257_v35 = vadd.f32 %v1256_v52, %v1188_v32 }
 0x173   : > { %v1326_v48 = vadd.f32 %v1325_v58, %v1257_v35  ;;  %v371_v58 = vld [vmem:[%s2053_s0 + $0x218] sm:$0xff] }
 0x174   : > { %v1120_v51 = vpop.f32.mrf.mxu2  ;;  %v566_v5 = vunpack.c.l.bf16 %v371_v58  ;;  %v567_v32 = vunpack.c.h.bf16 %v371_v58 }
 0x175   : > { %v1382_v52 = vadd.f32 %v1326_v48, %v944_v39  ;;  %v1121_v55 = vadd.f32 %v1120_v51, %v2350_v23  ;;  %v1189_v56 = vpop.f32.mrf.mxu3  ;;  %v372_v23 = vld [vmem:[%s2053_s0 + $0x220] sm:$0xff]  ;;  %v723_v48 = vmul.f32 %v2286_v27, %v573_v18 }
 0x176   : > { %v1261_v61 = vpop.f32.mrf.mxu0  ;;  %v568_v31 = vunpack.c.l.bf16 %v372_v23  ;;  %v569_v35 = vunpack.c.h.bf16 %v372_v23  ;;  %v717_v24 = vmul.f32 %v2286_v27, %v567_v32 }
 0x177   : > { %1407 = vst.msk [vmem:[#allocation2 + $0x10] sm:$0xff] %vm1404_vm1, %v1382_v52  ;;  %v1190_v50 = vadd.f32 %v1189_v56, %v1121_v55  ;;  %v725_v52 = vmul.f32 %v2288_v30, %v575_v37 }
 0x178   : > { %v1330_v3 = vpop.f32.mrf.mxu1  ;;  %v718_v43 = vmul.f32 %v2284_v26, %v568_v31  ;;  %v719_v51 = vmul.f32 %v2288_v30, %v569_v35  ;;  %v949_v35 = vld [vmem:[#allocation2 + $0x38] sm:$0xff] }
 0x179   : > { %v1259_v7 = vadd.f32 %v1258_v4, %v1190_v50  ;;  %1162 = vmatmul.bf16.gmra.mxu2 %v788_v57  ;;  %1300 = vmatmul.bf16.gmra.mxu0 %v790_v53  ;;  %v795_v50 = vpack.c.bf16 %v723_v48, %v717_v24 }
 0x17a   : > { %1231 = vmatmul.bf16.gmra.mxu3 %v789_v62 }
 0x17b   : > { %1369 = vmatmul.bf16.gmra.mxu1 %v791_v0  ;;  %v1328_v12 = vadd.f32 %v1327_v34, %v1259_v7  ;;  %v716_v34 = vmul.f32 %v2282_v22, %v566_v5 }
 0x17c   : > { %v1123_v13 = vpop.f32.mrf.mxu2 }
 0x17d   : > { %v1383_v19 = vadd.f32 %v1328_v12, %v945_v9  ;;  %v1124_v20 = vadd.f32 %v1123_v13, %v2362_v46  ;;  %v1192_v29 = vpop.f32.mrf.mxu3  ;;  %v724_v46 = vmul.f32 %v2284_v26, %v574_v33  ;;  %v794_v22 = vpack.c.bf16 %v722_v40, %v716_v34 }
 0x17e   : > { %v1263_v4 = vpop.f32.mrf.mxu0  ;;  %v797_v26 = vpack.c.bf16 %v725_v52, %v719_v51 }
 0x17f   : > { %1408 = vst.msk [vmem:[#allocation2 + $0x18] sm:$0xff] %vm1404_vm1, %v1383_v19  ;;  %v1193_v38 = vadd.f32 %v1192_v29, %v1124_v20  ;;  %v796_v62 = vpack.c.bf16 %v724_v46, %v718_v43 }
 0x180   : > { %v1332_v6 = vpop.f32.mrf.mxu1 }
 0x181   : > { %v1262_v39 = vadd.f32 %v1261_v61, %v1193_v38 }
 0x183   : > { %v1331_v55 = vadd.f32 %v1330_v3, %v1262_v39 }
 0x184   : > { %v1125_v56 = vpop.f32.mrf.mxu2 }
 0x185   : > { %v1384_v57 = vadd.f32 %v1331_v55, %v946_v44  ;;  %v1126_v53 = vadd.f32 %v1125_v56, %v2370_v2  ;;  %v1194_v61 = vpop.f32.mrf.mxu3  ;;  %v950_v44 = vld [vmem:[#allocation2 + $0x40] sm:$0xff] }
 0x186   : > { %v1266_v0 = vpop.f32.mrf.mxu0 }
 0x187   : > { %1409 = vst.msk [vmem:[#allocation2 + $0x20] sm:$0xff] %vm1404_vm1, %v1384_v57  ;;  %v1195_v7 = vadd.f32 %v1194_v61, %v1126_v53  ;;  %v951_v61 = vld [vmem:[#allocation2 + $0x48] sm:$0xff] }
 0x188   : > { %v1335_v58 = vpop.f32.mrf.mxu1 }
 0x189   : > { %v1264_v27 = vadd.f32 %v1263_v4, %v1195_v7  ;;  %1167 = vmatmul.bf16.gmra.mxu2 %v794_v22  ;;  %1305 = vmatmul.bf16.gmra.mxu0 %v796_v62 }
 0x18a   : > { %1236 = vmatmul.bf16.gmra.mxu3 %v795_v50 }
 0x18b   : > { %1374 = vmatmul.bf16.gmra.mxu1 %v797_v26  ;;  %v1333_v30 = vadd.f32 %v1332_v6, %v1264_v27 }
 0x18c   : > { %v1128_v3 = vpop.f32.mrf.mxu2 }
 0x18d   : > { %v1385_v9 = vadd.f32 %v1333_v30, %v947_v8  ;;  %v1129_v2 = vadd.f32 %v1128_v3, %v2382_v25  ;;  %v1197_v23 = vpop.f32.mrf.mxu3  ;;  %v952_v8 = vld [vmem:[#allocation2 + $0x50] sm:$0xff] }
 0x18e   : > { %v1268_v11 = vpop.f32.mrf.mxu0 }
 0x18f   : > { %1410 = vst.msk [vmem:[#allocation2 + $0x28] sm:$0xff] %vm1404_vm1, %v1385_v9  ;;  %v1198_v12 = vadd.f32 %v1197_v23, %v1129_v2 }
 0x190   : > { %v1337_v13 = vpop.f32.mrf.mxu1 }
 0x191   : > { %v1267_v5 = vadd.f32 %v1266_v0, %v1198_v12 }
 0x193   : > { %v1336_v19 = vadd.f32 %v1335_v58, %v1267_v5  ;;  %v953_v5 = vld [vmem:[#allocation2 + $0x58] sm:$0xff] }
 0x194   : > { %v1130_v20 = vpop.f32.mrf.mxu2 }
 0x195   : > { %v1386_v29 = vadd.f32 %v1336_v19, %v948_v15  ;;  %v1131_v31 = vadd.f32 %v1130_v20, %v2390_v49  ;;  %v1199_v33 = vpop.f32.mrf.mxu3 }
 0x196   : > { %v1271_v4 = vpop.f32.mrf.mxu0 }
 0x197   : > { %1411 = vst.msk [vmem:[#allocation2 + $0x30] sm:$0xff] %vm1404_vm1, %v1386_v29  ;;  %v1200_v32 = vadd.f32 %v1199_v33, %v1131_v31 }
 0x198   : > { %v1340_v18 = vpop.f32.mrf.mxu1 }
 0x199   : > { %v1269_v25 = vadd.f32 %v1268_v11, %v1200_v32 }
 0x19b   : > { %v1338_v37 = vadd.f32 %v1337_v13, %v1269_v25 }
 0x19c   : > { %v1133_v38 = vpop.f32.mrf.mxu2 }
 0x19d   : > { %v1387_v6 = vadd.f32 %v1338_v37, %v949_v35  ;;  %v1134_v34 = vadd.f32 %v1133_v38, %v2402_v10  ;;  %v1202_v39 = vpop.f32.mrf.mxu3 }
 0x19e   : > { %v1273_v40 = vpop.f32.mrf.mxu0 }
 0x19f   : > { %1412 = vst.msk [vmem:[#allocation2 + $0x38] sm:$0xff] %vm1404_vm1, %v1387_v6  ;;  %v1203_v43 = vadd.f32 %v1202_v39, %v1134_v34 }
 0x1a0   : > { %v1342_v46 = vpop.f32.mrf.mxu1 }
 0x1a1   : > { %v1272_v49 = vadd.f32 %v1271_v4, %v1203_v43  ;;  %v955_v43 = vld [vmem:[#allocation2 + $0x68] sm:$0xff] }
 0x1a3   : > { %v1341_v24 = vadd.f32 %v1340_v18, %v1272_v49  ;;  %v954_v18 = vld [vmem:[#allocation2 + $0x60] sm:$0xff] }
 0x1a4   : > { %v1135_v48 = vpop.f32.mrf.mxu2 }
 0x1a5   : > { %v1388_v51 = vadd.f32 %v1341_v24, %v950_v44  ;;  %v1136_v52 = vadd.f32 %v1135_v48, %v2410_v36  ;;  %v1204_v55 = vpop.f32.mrf.mxu3 }
 0x1a6   : > { %v1276_v56 = vpop.f32.mrf.mxu0 }
 0x1a7   : > { %1413 = vst.msk [vmem:[#allocation2 + $0x40] sm:$0xff] %vm1404_vm1, %v1388_v51  ;;  %v1205_v57 = vadd.f32 %v1204_v55, %v1136_v52 }
 0x1a8   : > { %v1345_v53 = vpop.f32.mrf.mxu1 }
 0x1a9   : > { %v1274_v10 = vadd.f32 %v1273_v40, %v1205_v57 }
 0x1ab   : > { %v1343_v22 = vadd.f32 %v1342_v46, %v1274_v10 }
 0x1ac   : > { %v1138_v62 = vpop.f32.mrf.mxu2 }
 0x1ad   : > { %v1389_v0 = vadd.f32 %v1343_v22, %v951_v61  ;;  %v1139_v50 = vadd.f32 %v1138_v62, %v2422_v60  ;;  %v1207_v26 = vpop.f32.mrf.mxu3 }
 0x1ae   : > { %v1278_v7 = vpop.f32.mrf.mxu0 }
 0x1af   : > { %1414 = vst.msk [vmem:[#allocation2 + $0x48] sm:$0xff] %vm1404_vm1, %v1389_v0  ;;  %v1208_v58 = vadd.f32 %v1207_v26, %v1139_v50  ;;  %v957_v26 = vld [vmem:[#allocation2 + $0x78] sm:$0xff] }
 0x1b0   : > { %v1347_v27 = vpop.f32.mrf.mxu1 }
 0x1b1   : > { %v1277_v36 = vadd.f32 %v1276_v56, %v1208_v58  ;;  %v956_v56 = vld [vmem:[#allocation2 + $0x70] sm:$0xff] }
 0x1b3   : > { %v1346_v30 = vadd.f32 %v1345_v53, %v1277_v36 }
 0x1b4   : > { %v1140_v3 = vpop.f32.mrf.mxu2 }
 0x1b5   : > { %v1390_v9 = vadd.f32 %v1346_v30, %v952_v8  ;;  %v1141_v2 = vadd.f32 %v1140_v3, %v2430_v21  ;;  %v1209_v23 = vpop.f32.mrf.mxu3 }
 0x1b6   : > { %v1281_v11 = vpop.f32.mrf.mxu0 }
 0x1b7   : > { %1415 = vst.msk [vmem:[#allocation2 + $0x50] sm:$0xff] %vm1404_vm1, %v1390_v9  ;;  %v1210_v12 = vadd.f32 %v1209_v23, %v1141_v2  ;;  %v958_v2 = vld [vmem:[#allocation2 + $0x80] sm:$0xff] }
 0x1b8   : > { %v1350_v13 = vpop.f32.mrf.mxu1 }
 0x1b9   : > { %v1279_v60 = vadd.f32 %v1278_v7, %v1210_v12 }
 0x1bb   : > { %v1348_v15 = vadd.f32 %v1347_v27, %v1279_v60 }
 0x1bc   : > { %v1143_v19 = vpop.f32.mrf.mxu2 }
 0x1bd   : > { %v1391_v20 = vadd.f32 %v1348_v15, %v953_v5  ;;  %v1144_v29 = vadd.f32 %v1143_v19, %v2328_v45  ;;  %v1212_v31 = vpop.f32.mrf.mxu3 }
 0x1be   : > { %v1283_v33 = vpop.f32.mrf.mxu0 }
 0x1bf   : > { %1416 = vst.msk [vmem:[#allocation2 + $0x58] sm:$0xff] %vm1404_vm1, %v1391_v20  ;;  %v1213_v4 = vadd.f32 %v1212_v31, %v1144_v29  ;;  %v959_v20 = vld [vmem:[#allocation2 + $0x88] sm:$0xff] }
 0x1c0   : > { %v1352_v32 = vpop.f32.mrf.mxu1 }
 0x1c1   : > { %v1282_v21 = vadd.f32 %v1281_v11, %v1213_v4 }
 0x1c3   : > { %v1351_v25 = vadd.f32 %v1350_v13, %v1282_v21 }
 0x1c4   : > { %v1145_v35 = vpop.f32.mrf.mxu2 }
 0x1c5   : > { %v1392_v37 = vadd.f32 %v1351_v25, %v954_v18  ;;  %v1146_v38 = vadd.f32 %v1145_v35, %v2340_v63  ;;  %v1214_v6 = vpop.f32.mrf.mxu3 }
 0x1c6   : > { %v1286_v34 = vpop.f32.mrf.mxu0 }
 0x1c7   : > { %1417 = vst.msk [vmem:[#allocation2 + $0x60] sm:$0xff] %vm1404_vm1, %v1392_v37  ;;  %v1215_v39 = vadd.f32 %v1214_v6, %v1146_v38 }
 0x1c8   : > { %v1355_v40 = vpop.f32.mrf.mxu1 }
 0x1c9   : > { %v1284_v45 = vadd.f32 %v1283_v33, %v1215_v39 }
 0x1cb   : > { %v1353_v46 = vadd.f32 %v1352_v32, %v1284_v45 }
 0x1cc   : > { %v1148_v49 = vpop.f32.mrf.mxu2 }
 0x1cd   : > { %v1393_v44 = vadd.f32 %v1353_v46, %v955_v43  ;;  %v1149_v24 = vadd.f32 %v1148_v49, %v2348_v16  ;;  %v1217_v48 = vpop.f32.mrf.mxu3  ;;  %v961_v43 = vld [vmem:[#allocation2 + $0x98] sm:$0xff] }
 0x1ce   : > { %v1288_v51 = vpop.f32.mrf.mxu0 }
 0x1cf   : > { %1418 = vst.msk [vmem:[#allocation2 + $0x68] sm:$0xff] %vm1404_vm1, %v1393_v44  ;;  %v1218_v52 = vadd.f32 %v1217_v48, %v1149_v24 }
 0x1d0   : > { %v1357_v55 = vpop.f32.mrf.mxu1 }
 0x1d1   : > { %v1287_v63 = vadd.f32 %v1286_v34, %v1218_v52 }
 0x1d3   : > { %v1356_v57 = vadd.f32 %v1355_v40, %v1287_v63  ;;  %v962_v63 = vld [vmem:[#allocation2 + $0xa0] sm:$0xff] }
 0x1d4   : > { %v1150_v53 = vpop.f32.mrf.mxu2 }
 0x1d5   : > { %v1394_v10 = vadd.f32 %v1356_v57, %v956_v56  ;;  %v1151_v61 = vadd.f32 %v1150_v53, %v2360_v41  ;;  %v1219_v22 = vpop.f32.mrf.mxu3 }
 0x1d6   : > { %v1291_v62 = vpop.f32.mrf.mxu0 }
 0x1d7   : > { %1419 = vst.msk [vmem:[#allocation2 + $0x70] sm:$0xff] %vm1404_vm1, %v1394_v10  ;;  %v1220_v0 = vadd.f32 %v1219_v22, %v1151_v61 }
 0x1d8   : > { %v1360_v50 = vpop.f32.mrf.mxu1 }
 0x1d9   : > { %v1289_v16 = vadd.f32 %v1288_v51, %v1220_v0 }
 0x1db   : > { %v1358_v7 = vadd.f32 %v1357_v55, %v1289_v16 }
 0x1dc   : > { %v1153_v58 = vpop.f32.mrf.mxu2 }
 0x1dd   : > { %v1395_v27 = vadd.f32 %v1358_v7, %v957_v26  ;;  %v1154_v36 = vadd.f32 %v1153_v58, %v2368_v59  ;;  %v1222_v8 = vpop.f32.mrf.mxu3 }
 0x1de   : > { %v1293_v30 = vpop.f32.mrf.mxu0 }
 0x1df   : > { %1420 = vst.msk [vmem:[#allocation2 + $0x78] sm:$0xff] %vm1404_vm1, %v1395_v27  ;;  %v1223_v3 = vadd.f32 %v1222_v8, %v1154_v36 }
 0x1e0   : > { %v1362_v9 = vpop.f32.mrf.mxu1 }
 0x1e1   : > { %v1292_v41 = vadd.f32 %v1291_v62, %v1223_v3 }
 0x1e3   : > { %v1361_v23 = vadd.f32 %v1360_v50, %v1292_v41  ;;  %v963_v50 = vld [vmem:[#allocation2 + $0xa8] sm:$0xff] }
 0x1e4   : > { %v1155_v11 = vpop.f32.mrf.mxu2 }
 0x1e5   : > { %v1396_v12 = vadd.f32 %v1361_v23, %v958_v2  ;;  %v1156_v13 = vadd.f32 %v1155_v11, %v2380_v17  ;;  %v1224_v60 = vpop.f32.mrf.mxu3  ;;  %v960_v17 = vld [vmem:[#allocation2 + $0x90] sm:$0xff] }
 0x1e6   : > { %v1296_v5 = vpop.f32.mrf.mxu0 }
 0x1e7   : > { %1421 = vst.msk [vmem:[#allocation2 + $0x80] sm:$0xff] %vm1404_vm1, %v1396_v12  ;;  %v1225_v15 = vadd.f32 %v1224_v60, %v1156_v13  ;;  %v965_v60 = vld [vmem:[#allocation2 + $0xb8] sm:$0xff] }
 0x1e8   : > { %v1365_v19 = vpop.f32.mrf.mxu1 }
 0x1e9   : > { %v1294_v59 = vadd.f32 %v1293_v30, %v1225_v15 }
 0x1eb   : > { %v1363_v29 = vadd.f32 %v1362_v9, %v1294_v59 }
 0x1ec   : > { %v1158_v31 = vpop.f32.mrf.mxu2 }
 0x1ed   : > { %v1397_v33 = vadd.f32 %v1363_v29, %v959_v20  ;;  %v1159_v4 = vadd.f32 %v1158_v31, %v2388_v42  ;;  %v1227_v32 = vpop.f32.mrf.mxu3 }
 0x1ee   : > { %v1298_v18 = vpop.f32.mrf.mxu0 }
 0x1ef   : > { %1422 = vst.msk [vmem:[#allocation2 + $0x88] sm:$0xff] %vm1404_vm1, %v1397_v33  ;;  %v1228_v21 = vadd.f32 %v1227_v32, %v1159_v4 }
 0x1f0   : > { %v1367_v35 = vpop.f32.mrf.mxu1 }
 0x1f1   : > { %v1297_v25 = vadd.f32 %v1296_v5, %v1228_v21 }
 0x1f3   : > { %v1366_v37 = vadd.f32 %v1365_v19, %v1297_v25 }
 0x1f4   : > { %v1160_v38 = vpop.f32.mrf.mxu2 }
 0x1f5   : > { %v1398_v6 = vadd.f32 %v1366_v37, %v960_v17  ;;  %v1161_v34 = vadd.f32 %v1160_v38, %v2400_v1  ;;  %v1229_v39 = vpop.f32.mrf.mxu3 }
 0x1f6   : > { %v1301_v42 = vpop.f32.mrf.mxu0 }
 0x1f7   : > { %1423 = vst.msk [vmem:[#allocation2 + $0x90] sm:$0xff] %vm1404_vm1, %v1398_v6  ;;  %v1230_v40 = vadd.f32 %v1229_v39, %v1161_v34 }
 0x1f8   : > { %v1370_v49 = vpop.f32.mrf.mxu1 }
 0x1f9   : > { %v1299_v45 = vadd.f32 %v1298_v18, %v1230_v40 }
 0x1fb   : > { %v1368_v46 = vadd.f32 %v1367_v35, %v1299_v45 }
 0x1fc   : > { %v1163_v44 = vpop.f32.mrf.mxu2 }
 0x1fd   : > { %v1399_v24 = vadd.f32 %v1368_v46, %v961_v43  ;;  %v1164_v48 = vadd.f32 %v1163_v44, %v2408_v28  ;;  %v1232_v51 = vpop.f32.mrf.mxu3 }
 0x1fe   : > { %v1303_v56 = vpop.f32.mrf.mxu0 }
 0x1ff   : > { %1424 = vst.msk [vmem:[#allocation2 + $0x98] sm:$0xff] %vm1404_vm1, %v1399_v24  ;;  %v1233_v52 = vadd.f32 %v1232_v51, %v1164_v48 }
 0x200   : > { %v1372_v22 = vpop.f32.mrf.mxu1 }
 0x201   : > { %v1302_v55 = vadd.f32 %v1301_v42, %v1233_v52 }
 0x203   : > { %v1371_v1 = vadd.f32 %v1370_v49, %v1302_v55 }
 0x204   : > { %v1165_v57 = vpop.f32.mrf.mxu2 }
 0x205   : > { %v1400_v53 = vadd.f32 %v1371_v1, %v962_v63  ;;  %v1166_v10 = vadd.f32 %v1165_v57, %v2420_v54  ;;  %v1234_v61 = vpop.f32.mrf.mxu3  ;;  %v964_v54 = vld [vmem:[#allocation2 + $0xb0] sm:$0xff] }
 0x206   : > { %v1306_v27 = vpop.f32.mrf.mxu0 }
 0x207   : > { %1425 = vst.msk [vmem:[#allocation2 + $0xa0] sm:$0xff] %vm1404_vm1, %v1400_v53  ;;  %v1235_v62 = vadd.f32 %v1234_v61, %v1166_v10 }
 0x208   : > { %v1375_v8 = vpop.f32.mrf.mxu1 }
 0x209   : > { %v1304_v0 = vadd.f32 %v1303_v56, %v1235_v62 }
 0x20b   : > { %v1373_v28 = vadd.f32 %v1372_v22, %v1304_v0 }
 0x20c   : > { %v1168_v16 = vpop.f32.mrf.mxu2 }
 0x20d   : > { %v1401_v26 = vadd.f32 %v1373_v28, %v963_v50  ;;  %v1169_v7 = vadd.f32 %v1168_v16, %v2428_v14  ;;  %v1237_v58 = vpop.f32.mrf.mxu3 }
 0x20e   : > { %v1308_v12 = vpop.f32.mrf.mxu0 }
 0x20f   : > { %1426 = vst.msk [vmem:[#allocation2 + $0xa8] sm:$0xff] %vm1404_vm1, %v1401_v26  ;;  %v1238_v36 = vadd.f32 %v1237_v58, %v1169_v7 }
 0x210   : > { %v1377_v14 = vpop.f32.mrf.mxu1 }
 0x211   : > { %v1307_v30 = vadd.f32 %v1306_v27, %v1238_v36 }
 0x213   : > { %v1376_v3 = vadd.f32 %v1375_v8, %v1307_v30 }
 0x214   : > { %v1170_v9 = vpop.f32.mrf.mxu2 }
 0x215   : > { %v1402_v41 = vadd.f32 %v1376_v3, %v964_v54  ;;  %v1171_v2 = vadd.f32 %v1170_v9, %v2440_v47  ;;  %v1239_v23 = vpop.f32.mrf.mxu3 }
 0x217   : > { %1427 = vst.msk [vmem:[#allocation2 + $0xb0] sm:$0xff] %vm1404_vm1, %v1402_v41  ;;  %v1240_v11 = vadd.f32 %v1239_v23, %v1171_v2 }
 0x219   : > { %v1309_v13 = vadd.f32 %v1308_v12, %v1240_v11 }
 0x21b   : > { %v1378_v5 = vadd.f32 %v1377_v14, %v1309_v13  ;;  %1432 = sbr.rel (%p1607_p9) target bundleno = 569 (0x239), region = 48 }
 0x21d   : > { %v1403_v15 = vadd.f32 %v1378_v5, %v965_v60 }
 0x21f   : > { %1428 = vst.msk [vmem:[#allocation2 + $0xb8] sm:$0xff] %vm1404_vm1, %v1403_v15 }
 0x220   : > { %v1433_v19 = vld [vmem:[#allocation2] sm:$0xff]  ;;  %v1434_v47 = vld [vmem:[#allocation2 + $0x8] sm:$0xff]  ;;  %v1435_v59 = vld [vmem:[#allocation2 + $0x10] sm:$0xff] }
 0x221   : > { %1457 = vst.msk [vmem:[%s2069_s9] sm:$0xff] %vm1404_vm1, %v1433_v19  ;;  %v1436_v20 = vld [vmem:[#allocation2 + $0x18] sm:$0xff]  ;;  %v1437_v29 = vld [vmem:[#allocation2 + $0x20] sm:$0xff]  ;;  %v1438_v31 = vld [vmem:[#allocation2 + $0x28] sm:$0xff] }
 0x222   : > { %1458 = vst.msk [vmem:[%s2069_s9 + $0x8] sm:$0xff] %vm1404_vm1, %v1434_v47  ;;  %v1439_v33 = vld [vmem:[#allocation2 + $0x30] sm:$0xff]  ;;  %v1440_v4 = vld [vmem:[#allocation2 + $0x38] sm:$0xff]  ;;  %v1441_v32 = vld [vmem:[#allocation2 + $0x40] sm:$0xff] }
 0x223   : > { %1459 = vst.msk [vmem:[%s2069_s9 + $0x10] sm:$0xff] %vm1404_vm1, %v1435_v59  ;;  %v1442_v21 = vld [vmem:[#allocation2 + $0x48] sm:$0xff]  ;;  %v1443_v18 = vld [vmem:[#allocation2 + $0x50] sm:$0xff]  ;;  %v1444_v25 = vld [vmem:[#allocation2 + $0x58] sm:$0xff] }
 0x224   : > { %1460 = vst.msk [vmem:[%s2069_s9 + $0x18] sm:$0xff] %vm1404_vm1, %v1436_v20  ;;  %v1445_v17 = vld [vmem:[#allocation2 + $0x60] sm:$0xff]  ;;  %v1446_v35 = vld [vmem:[#allocation2 + $0x68] sm:$0xff]  ;;  %v1447_v37 = vld [vmem:[#allocation2 + $0x70] sm:$0xff] }
 0x225   : > { %1461 = vst.msk [vmem:[%s2069_s9 + $0x20] sm:$0xff] %vm1404_vm1, %v1437_v29  ;;  %v1448_v38 = vld [vmem:[#allocation2 + $0x78] sm:$0xff]  ;;  %v1449_v6 = vld [vmem:[#allocation2 + $0x80] sm:$0xff]  ;;  %v1450_v34 = vld [vmem:[#allocation2 + $0x88] sm:$0xff] }
 0x226   : > { %1462 = vst.msk [vmem:[%s2069_s9 + $0x28] sm:$0xff] %vm1404_vm1, %v1438_v31  ;;  %v1451_v39 = vld [vmem:[#allocation2 + $0x90] sm:$0xff]  ;;  %v1452_v40 = vld [vmem:[#allocation2 + $0x98] sm:$0xff]  ;;  %v1453_v45 = vld [vmem:[#allocation2 + $0xa0] sm:$0xff] }
 0x227   : > { %1463 = vst.msk [vmem:[%s2069_s9 + $0x30] sm:$0xff] %vm1404_vm1, %v1439_v33  ;;  %v1454_v43 = vld [vmem:[#allocation2 + $0xa8] sm:$0xff]  ;;  %v1455_v42 = vld [vmem:[#allocation2 + $0xb0] sm:$0xff]  ;;  %v1456_v46 = vld [vmem:[#allocation2 + $0xb8] sm:$0xff] }
 0x228   : > { %1464 = vst.msk [vmem:[%s2069_s9 + $0x38] sm:$0xff] %vm1404_vm1, %v1440_v4 }
 0x229   : > { %1465 = vst.msk [vmem:[%s2069_s9 + $0x40] sm:$0xff] %vm1404_vm1, %v1441_v32 }
 0x22a   : > { %1466 = vst.msk [vmem:[%s2069_s9 + $0x48] sm:$0xff] %vm1404_vm1, %v1442_v21 }
 0x22b   : > { %1467 = vst.msk [vmem:[%s2069_s9 + $0x50] sm:$0xff] %vm1404_vm1, %v1443_v18 }
 0x22c   : > { %1468 = vst.msk [vmem:[%s2069_s9 + $0x58] sm:$0xff] %vm1404_vm1, %v1444_v25 }
 0x22d   : > { %1469 = vst.msk [vmem:[%s2069_s9 + $0x60] sm:$0xff] %vm1404_vm1, %v1445_v17 }
 0x22e   : > { %1470 = vst.msk [vmem:[%s2069_s9 + $0x68] sm:$0xff] %vm1404_vm1, %v1446_v35 }
 0x22f   : > { %1471 = vst.msk [vmem:[%s2069_s9 + $0x70] sm:$0xff] %vm1404_vm1, %v1447_v37 }
 0x230   : > { %1472 = vst.msk [vmem:[%s2069_s9 + $0x78] sm:$0xff] %vm1404_vm1, %v1448_v38 }
 0x231   : > { %1473 = vst.msk [vmem:[%s2069_s9 + $0x80] sm:$0xff] %vm1404_vm1, %v1449_v6 }
 0x232   : > { %1474 = vst.msk [vmem:[%s2069_s9 + $0x88] sm:$0xff] %vm1404_vm1, %v1450_v34 }
 0x233   : > { %1475 = vst.msk [vmem:[%s2069_s9 + $0x90] sm:$0xff] %vm1404_vm1, %v1451_v39 }
 0x234   : > { %1476 = vst.msk [vmem:[%s2069_s9 + $0x98] sm:$0xff] %vm1404_vm1, %v1452_v40 }
 0x235   : > { %1477 = vst.msk [vmem:[%s2069_s9 + $0xa0] sm:$0xff] %vm1404_vm1, %v1453_v45 }
 0x236   : > { %1478 = vst.msk [vmem:[%s2069_s9 + $0xa8] sm:$0xff] %vm1404_vm1, %v1454_v43 }
 0x237   : > { %1479 = vst.msk [vmem:[%s2069_s9 + $0xb0] sm:$0xff] %vm1404_vm1, %v1455_v42 }
 0x238   : > { %1480 = vst.msk [vmem:[%s2069_s9 + $0xb8] sm:$0xff] %vm1404_vm1, %v1456_v46 }
 0x239 PF: > { %s19_s22 = sadd.s32 1, %s1890_s22   ;;  %s2627_s18 = sld [smem:[#allocation9_spill]] }
 0x23a   : > { %p16_p10 = scmp.ge.s32.totalorder %s19_s22, 8   ;;  %s2628_s19 = sld [smem:[#allocation10_spill]] }
 0x23b   : > { %s2629_s20 = sld [smem:[#allocation11_spill]]  ;;  %s2631_s12 = smov %s1854_s13 }
 0x23c   : > { %s2630_s21 = sld [smem:[#allocation12_spill]]  ;;  %s2632_s13 = smov %s1858_s14 }
 0x23d   : > { %s2633_s14 = smov %s2005_s7  ;;  %s2634_s15 = smov %s1866_s16 }
 0x23e   : > { %s2635_s16 = smov %s1870_s17  ;;  %s2636_s17 = smov %s1991_s29 }
 0x23f   :  { %18 = sbr.rel (!%p16_p10) target bundleno = 11 (0xb), region = 96 }
 0x244   :  { %1503 = vsyncpa [#allocation4], 1 }
 0x245   :  { %1505 = vsyncpa [#allocation4 + $0x1], 1 }
 0x246   :  { %1506 = vsyncpa [#allocation6], 1 }
 0x247   :  { %1508 = vsyncpa [#allocation6 + $0x1], 1 }

</bundles_post_ra>
